<compile_context>
chip_gen: v5e
topology: v5e:2x2
jax: 0.10.0
libtpu: 0.0.40
codegen_flags: <defaults>
</compile_context>

<pallas_src>
import functools

import jax
import jax.numpy as jnp
import numpy as np
from jax.experimental import pallas as pl
from jax.experimental.pallas import tpu as pltpu

BN_EPS = 1e-5
LANE = 128
VMEM_LIMIT = 48 * 1024 * 1024  # < 64 MiB (v7x physical), > default scoped limits


# ----------------------------------------------------------------------------
# small helpers
# ----------------------------------------------------------------------------
def _round_up(x, m):
    return (x + m - 1) // m * m


def _pad_last(x, target):
    c = x.shape[-1]
    if c == target:
        return x
    pad = [(0, 0)] * (x.ndim - 1) + [(0, target - c)]
    return jnp.pad(x, pad)


def _row_tile(ho, wo, target=512):
    """Largest divisor th of ho with th*wo <= target (at least 1)."""
    best = 1
    for t in range(1, ho + 1):
        if ho % t == 0 and t * wo <= max(target, wo):
            best = t
    return best


def _m_tile(m, target=1024):
    """Largest multiple-of-8 divisor of m that is <= target (fallback: m)."""
    if m <= target:
        return m
    best = None
    for t in range(8, target + 1, 8):
        if m % t == 0:
            best = t
    return best if best is not None else m


# ----------------------------------------------------------------------------
# Kernel A: conv (kh x kw, stride via phase-split) + per-tile BN partial stats
# ----------------------------------------------------------------------------
def _conv_stats_kernel(kh, kw, stride, th, wo, nph_h, nph_w, *refs):
    nph = nph_h * nph_w
    x_refs = refs[:nph]                      # phase tensors (1, Hph, Wph, Cin)
    w_ref = refs[nph]                        # (kh*kw, Cin, Cout) bf16
    y_ref, ssum_ref, ssq_ref = refs[nph + 1:]

    r = pl.program_id(1)
    cout = w_ref.shape[-1]
    acc = jnp.zeros((th * wo, cout), jnp.float32)
    row0 = r * th

    for ky in range(kh):
        for kx in range(kw):
            ph = (ky % stride) * nph_w + (kx % stride)
            xs = x_refs[ph][0,
                            pl.ds(row0 + ky // stride, th),
                            pl.ds(kx // stride, wo),
                            :]                                   # (th, wo, Cin)
            acc += jnp.dot(xs.reshape(th * wo, xs.shape[-1]),
                           w_ref[ky * kw + kx],
                           preferred_element_type=jnp.float32)

    y_ref[...] = acc.reshape(1, th, wo, cout).astype(y_ref.dtype)
    ssum_ref[...] = jnp.sum(acc, axis=0, keepdims=True).reshape(1, 1, 1, cout)
    ssq_ref[...] = jnp.sum(acc * acc, axis=0, keepdims=True).reshape(1, 1, 1, cout)


def conv2d_bn_stats(x_nhwc, w_taps, kh, kw, pad, stride, *, row_tile_target=512):
    """x_nhwc: (N,H,W,Cinp) bf16 (channel-padded).  w_taps: (kh*kw,Cinp,Coutp) bf16.

    Returns: raw conv y (N,Ho,Wo,Coutp) f32, per-channel sum/sumsq (Coutp,) f32,
    and (Ho, Wo).
    """
    n, h, w, cin = x_nhwc.shape
    cout = w_taps.shape[-1]
    ho = (h + 2 * pad - kh) // stride + 1
    wo = (w + 2 * pad - kw) // stride + 1

    # Spatial pad so every stride-phase has identical shape; phases partition
    # the data (no inflation, unlike im2col).
    hp2 = stride * (ho + (kh - 1) // stride)
    wp2 = stride * (wo + (kw - 1) // stride)
    xp = jnp.pad(x_nhwc, ((0, 0), (pad, hp2 - h - pad), (pad, wp2 - w - pad), (0, 0)))

    nph_h = min(stride, kh)
    nph_w = min(stride, kw)
    phases = [xp[:, a::stride, b::stride, :]
              for a in range(nph_h) for b in range(nph_w)]

    th = _row_tile(ho, wo, row_tile_target)
    r_tiles = ho // th
    grid = (n, r_tiles)

    phase_spec = pl.BlockSpec((1,) + phases[0].shape[1:],
                              lambda i, r: (i, 0, 0, 0))
    w_spec = pl.BlockSpec(w_taps.shape, lambda i, r: (0, 0, 0))

    m = n * ho * wo
    cost = pl.CostEstimate(
        flops=int(2 * m * kh * kw * cin * cout),
        transcendentals=0,
        bytes_accessed=int(x_nhwc.size * x_nhwc.dtype.itemsize
                           + w_taps.size * w_taps.dtype.itemsize
                           + m * cout * 4))

    kernel = functools.partial(_conv_stats_kernel, kh, kw, stride, th, wo,
                               nph_h, nph_w)

    y, ssum, ssq = pl.pallas_call(
        kernel,
        grid=grid,
        in_specs=[phase_spec] * len(phases) + [w_spec],
        out_specs=(
            pl.BlockSpec((1, th, wo, cout), lambda i, r: (i, r, 0, 0)),
            pl.BlockSpec((1, 1, 1, cout), lambda i, r: (i, r, 0, 0)),
            pl.BlockSpec((1, 1, 1, cout), lambda i, r: (i, r, 0, 0)),
        ),
        out_shape=(
            jax.ShapeDtypeStruct((n, ho, wo, cout), jnp.float32),
            jax.ShapeDtypeStruct((n, r_tiles, 1, cout), jnp.float32),
            jax.ShapeDtypeStruct((n, r_tiles, 1, cout), jnp.float32),
        ),
        compiler_params=pltpu.CompilerParams(
            dimension_semantics=("parallel", "parallel"),
            vmem_limit_bytes=VMEM_LIMIT),
        cost_estimate=cost,
    )(*phases, w_taps)

    chan_sum = jnp.sum(ssum, axis=(0, 1, 2))
    chan_sq = jnp.sum(ssq, axis=(0, 1, 2))
    return y, chan_sum, chan_sq, (ho, wo)


# ----------------------------------------------------------------------------
# Kernel B: BN affine (+ fused shortcut BN + residual) (+ ReLU), M-tiled
# ----------------------------------------------------------------------------
def _bn_finalize_kernel(relu, has_res, y_ref, s_ref, b_ref, *rest):
    if has_res:
        r_ref, rs_ref, rb_ref, o_ref = rest
    else:
        (o_ref,) = rest
    out = y_ref[...].astype(jnp.float32) * s_ref[...] + b_ref[...]
    if has_res:
        out = out + r_ref[...].astype(jnp.float32) * rs_ref[...] + rb_ref[...]
    if relu:
        out = jnp.maximum(out, 0.0)
    o_ref[...] = out.astype(o_ref.dtype)


def bn_finalize(y, scale, bias, residual=None, res_scale=None, res_bias=None,
                relu=True, out_dtype=jnp.bfloat16, m_tile_target=1024):
    m, c = y.shape
    tm = _m_tile(m, m_tile_target)
    grid = (m // tm,)

    row_spec = pl.BlockSpec((tm, c), lambda i: (i, 0))
    vec_spec = pl.BlockSpec((1, c), lambda i: (0, 0))

    inputs = [y, scale.reshape(1, c).astype(jnp.float32),
              bias.reshape(1, c).astype(jnp.float32)]
    in_specs = [row_spec, vec_spec, vec_spec]

    has_res = residual is not None
    if has_res:
        inputs += [residual.reshape(m, c),
                   res_scale.reshape(1, c).astype(jnp.float32),
                   res_bias.reshape(1, c).astype(jnp.float32)]
        in_specs += [row_spec, vec_spec, vec_spec]

    kernel = functools.partial(_bn_finalize_kernel, relu, has_res)
    return pl.pallas_call(
        kernel,
        grid=grid,
        in_specs=in_specs,
        out_specs=row_spec,
        out_shape=jax.ShapeDtypeStruct((m, c), out_dtype),
        compiler_params=pltpu.CompilerParams(
            dimension_semantics=("parallel",),
            vmem_limit_bytes=VMEM_LIMIT),
    )(*inputs)


# ----------------------------------------------------------------------------
# BN glue (tiny per-channel ops between the two Pallas passes)
# ----------------------------------------------------------------------------
def _bn_scale_bias(chan_sum, chan_sq, count, gamma_p, beta_p):
    mean = chan_sum / count
    var = jnp.maximum(chan_sq / count - mean * mean, 0.0)
    inv = jax.lax.rsqrt(var + BN_EPS)
    scale = gamma_p * inv
    bias = beta_p - mean * scale
    return scale, bias


def _weight_taps(w_oihw, cinp, coutp):
    """PyTorch (Cout,Cin,KH,KW) -> (KH*KW, Cinp, Coutp) bf16, channel-padded."""
    cout, cin, kh, kw = w_oihw.shape
    w = jnp.transpose(w_oihw, (2, 3, 1, 0)).reshape(kh * kw, cin, cout)
    w = jnp.pad(w, ((0, 0), (0, cinp - cin), (0, coutp - cout)))
    return w.astype(jnp.bfloat16)


# ----------------------------------------------------------------------------
# BasicBlock params + forward
# ----------------------------------------------------------------------------
def init_basic_block(key, cin, cout, stride):
    ks = jax.random.split(key, 9)
    p = {"stride": stride, "cin": cin, "cout": cout,
         "use_proj": (stride != 1) or (cin != cout)}
    p["w1"] = (jax.random.normal(ks[0], (cout, cin, 3, 3), jnp.float32)
               * (2.0 / (cin * 9)) ** 0.5).astype(jnp.bfloat16)
    p["g1"] = 1.0 + 0.1 * jax.random.normal(ks[1], (cout,), jnp.float32)
    p["b1"] = 0.1 * jax.random.normal(ks[2], (cout,), jnp.float32)
    p["w2"] = (jax.random.normal(ks[3], (cout, cout, 3, 3), jnp.float32)
               * (2.0 / (cout * 9)) ** 0.5).astype(jnp.bfloat16)
    p["g2"] = 1.0 + 0.1 * jax.random.normal(ks[4], (cout,), jnp.float32)
    p["b2"] = 0.1 * jax.random.normal(ks[5], (cout,), jnp.float32)
    if p["use_proj"]:
        p["wsc"] = (jax.random.normal(ks[6], (cout, cin, 1, 1), jnp.float32)
                    * (2.0 / cin) ** 0.5).astype(jnp.bfloat16)
        p["gsc"] = 1.0 + 0.1 * jax.random.normal(ks[7], (cout,), jnp.float32)
        p["bsc"] = 0.1 * jax.random.normal(ks[8], (cout,), jnp.float32)
    return p


def basic_block_forward(params, x_nchw):
    s = params["stride"]
    cin, cout = params["cin"], params["cout"]
    cinp = _round_up(cin, LANE)
    coutp = _round_up(cout, LANE)

    x = jnp.transpose(x_nchw, (0, 2, 3, 1)).astype(jnp.bfloat16)  # NCHW -> NHWC
    x = _pad_last(x, cinp)
    n = x.shape[0]

    # conv1 (3x3, stride s, pad 1) + BN1 + ReLU
    w1 = _weight_taps(params["w1"], cinp, coutp)
    y1, s1, q1, (ho, wo) = conv2d_bn_stats(x, w1, 3, 3, 1, s)
    m = n * ho * wo
    g1 = _pad_last(params["g1"].reshape(1, cout), coutp)[0]
    b1 = _pad_last(params["b1"].reshape(1, cout), coutp)[0]
    sc1, bi1 = _bn_scale_bias(s1, q1, m, g1, b1)
    h = bn_finalize(y1.reshape(m, coutp), sc1, bi1, relu=True)   # bf16 (M, Cp)
    h_nhwc = h.reshape(n, ho, wo, coutp)

    # shortcut branch (projection BN is fused into conv2's finalize pass)
    if params["use_proj"]:
        wsc = _weight_taps(params["wsc"], cinp, coutp)
        ysc, ssc, qsc, _ = conv2d_bn_stats(x, wsc, 1, 1, 0, s)
        gsc = _pad_last(params["gsc"].reshape(1, cout), coutp)[0]
        bsc = _pad_last(params["bsc"].reshape(1, cout), coutp)[0]
        rsc, rbi = _bn_scale_bias(ssc, qsc, m, gsc, bsc)
        res = ysc.reshape(m, coutp)
    else:
        res = x.reshape(m, coutp)                                # identity
        rsc = jnp.ones((coutp,), jnp.float32)
        rbi = jnp.zeros((coutp,), jnp.float32)

    # conv2 (3x3, stride 1, pad 1) + BN2 + residual + final ReLU
    w2 = _weight_taps(params["w2"], coutp, coutp)
    y2, s2, q2, _ = conv2d_bn_stats(h_nhwc, w2, 3, 3, 1, 1)
    g2 = _pad_last(params["g2"].reshape(1, cout), coutp)[0]
    b2 = _pad_last(params["b2"].reshape(1, cout), coutp)[0]
    sc2, bi2 = _bn_scale_bias(s2, q2, m, g2, b2)
    out = bn_finalize(y2.reshape(m, coutp), sc2, bi2,
                      residual=res, res_scale=rsc, res_bias=rbi, relu=True)

    out = out.reshape(n, ho, wo, coutp)[..., :cout]
    return jnp.transpose(out, (0, 3, 1, 2))                      # NCHW (bf16)


# ----------------------------------------------------------------------------
# Pure-JAX reference (f32) for correctness check
# ----------------------------------------------------------------------------
def _conv_nhwc(x, w_oihw, stride, pad):
    w = jnp.transpose(w_oihw.astype(jnp.float32), (2, 3, 1, 0))  # HWIO
    return jax.lax.conv_general_dilated(
        x, w, window_strides=(stride, stride),
        padding=((pad, pad), (pad, pad)),
        dimension_numbers=("NHWC", "HWIO", "NHWC"),
        precision=jax.lax.Precision.HIGHEST)


def _bn_train(x, gamma, beta):
    mean = jnp.mean(x, axis=(0, 1, 2), keepdims=True)
    var = jnp.mean(jnp.square(x - mean), axis=(0, 1, 2), keepdims=True)
    return (x - mean) * jax.lax.rsqrt(var + BN_EPS) * gamma + beta


def basic_block_ref(params, x_nchw):
    x = jnp.transpose(x_nchw.astype(jnp.float32), (0, 2, 3, 1))
    s = params["stride"]
    h = jnp.maximum(_bn_train(_conv_nhwc(x, params["w1"], s, 1),
                              params["g1"], params["b1"]), 0.0)
    h2 = _bn_train(_conv_nhwc(h, params["w2"], 1, 1), params["g2"], params["b2"])
    if params["use_proj"]:
        sc = _bn_train(_conv_nhwc(x, params["wsc"], s, 0),
                       params["gsc"], params["bsc"])
    else:
        sc = x
    out = jnp.maximum(h2 + sc, 0.0)
    return jnp.transpose(out, (0, 3, 1, 2))


if __name__ == "__main__":
    key = jax.random.PRNGKey(0)
    kx, kp1, kp2 = jax.random.split(key, 3)

    # NCHW input like PyTorch; pre-quantize to bf16 values so the reference and
    # the bf16 kernel path see identical inputs.
    x = jax.random.normal(kx, (2, 4, 16, 16), jnp.float32)
    x = x.astype(jnp.bfloat16).astype(jnp.float32)

    # Block with projection shortcut (stride=2, channels 4 -> 8)
    p_down = init_basic_block(kp1, 4, 8, stride=2)
    y1 = basic_block_forward(p_down, x)
    jax.block_until_ready(y1)

    # Block with identity shortcut (stride=1, 8 -> 8)
    y1_f32 = jnp.asarray(y1, jnp.float32)
    p_id = init_basic_block(kp2, 8, 8, stride=1)
    y2 = basic_block_forward(p_id, y1_f32)
    jax.block_until_ready(y2)

    # Correctness vs pure-JAX f32 reference (per-block comparison; bf16 path
    # tolerance).
    r1 = basic_block_ref(p_down, x)
    r2 = basic_block_ref(p_id, y1_f32)
    np.testing.assert_allclose(np.asarray(y1_f32), np.asarray(r1),
                               rtol=3e-2, atol=3e-2)
    np.testing.assert_allclose(np.asarray(jnp.asarray(y2, jnp.float32)),
                               np.asarray(r2), rtol=3e-2, atol=3e-2)

    print("KERNEL_OK")
</pallas_src>

<mosaic_0001>
module attributes {stable_mosaic.version = 11 : i64} {
  func.func @_conv_stats_kernel(%arg0: i32, %arg1: i32, %arg2: memref<1x9x9x128xbf16, #tpu.memory_space<vmem>>, %arg3: memref<1x9x9x128xbf16, #tpu.memory_space<vmem>>, %arg4: memref<1x9x9x128xbf16, #tpu.memory_space<vmem>>, %arg5: memref<1x9x9x128xbf16, #tpu.memory_space<vmem>>, %arg6: memref<9x128x128xbf16, #tpu.memory_space<vmem>>, %arg7: memref<1x8x8x128xf32, #tpu.memory_space<vmem>>, %arg8: memref<1x1x1x128xf32, #tpu.memory_space<vmem>>, %arg9: memref<1x1x1x128xf32, #tpu.memory_space<vmem>>) attributes {dimension_semantics = [#tpu.dimension_semantics<parallel>, #tpu.dimension_semantics<parallel>], iteration_bounds = array<i64: 2, 1>, scalar_prefetch = 0 : i64, scratch_operands = 0 : i64, tpu.core_type = #tpu.core_type<tc>, window_params = [{transform_indices = @transform_0, window_bounds = array<i64: 1, 9, 9, 128>}, {transform_indices = @transform_1, window_bounds = array<i64: 1, 9, 9, 128>}, {transform_indices = @transform_2, window_bounds = array<i64: 1, 9, 9, 128>}, {transform_indices = @transform_3, window_bounds = array<i64: 1, 9, 9, 128>}, {pipeline_mode = #tpu.pipeline_mode<synchronous>, transform_indices = @transform_4, window_bounds = array<i64: 9, 128, 128>}, {transform_indices = @transform_5, window_bounds = array<i64: 1, 8, 8, 128>}, {transform_indices = @transform_6, window_bounds = array<i64: 1, 1, 1, 128>}, {transform_indices = @transform_7, window_bounds = array<i64: 1, 1, 1, 128>}]} {
    %cst = arith.constant 0.000000e+00 : f32
    %0 = vector.broadcast %cst : f32 to vector<64x128xf32>
    %c8_i32 = arith.constant 8 : i32
    %1 = arith.muli %arg1, %c8_i32 : i32
    %c0_i32 = arith.constant 0 : i32
    %2 = arith.addi %1, %c0_i32 : i32
    %c0 = arith.constant 0 : index
    %3 = arith.index_cast %2 : i32 to index
    %c0_0 = arith.constant 0 : index
    %c0_1 = arith.constant 0 : index
    %4 = vector.load %arg2[%c0, %3, %c0_0, %c0_1] : memref<1x9x9x128xbf16, #tpu.memory_space<vmem>>, vector<1x8x8x128xbf16>
    %5 = vector.shape_cast %4 : vector<1x8x8x128xbf16> to vector<8x8x128xbf16>
    %6 = vector.shape_cast %5 : vector<8x8x128xbf16> to vector<64x128xbf16>
    %c0_2 = arith.constant 0 : index
    %c0_3 = arith.constant 0 : index
    %c0_4 = arith.constant 0 : index
    %7 = vector.load %arg6[%c0_2, %c0_3, %c0_4] : memref<9x128x128xbf16, #tpu.memory_space<vmem>>, vector<1x128x128xbf16>
    %8 = vector.shape_cast %7 : vector<1x128x128xbf16> to vector<128x128xbf16>
    %cst_5 = arith.constant dense<0.000000e+00> : vector<64x128xf32>
    %9 = tpu.matmul %6, %8, %cst_5 {dimension_numbers = #tpu.dot_dimension_numbers<[1], [0], [0], [1], [0, 0, 1, 1], [], []>} : vector<64x128xbf16>, vector<128x128xbf16>, vector<64x128xf32> -> vector<64x128xf32>
    %10 = arith.addf %0, %9 : vector<64x128xf32>
    %c0_i32_6 = arith.constant 0 : i32
    %11 = arith.addi %1, %c0_i32_6 : i32
    %c0_7 = arith.constant 0 : index
    %12 = arith.index_cast %11 : i32 to index
    %c0_8 = arith.constant 0 : index
    %c0_9 = arith.constant 0 : index
    %13 = vector.load %arg3[%c0_7, %12, %c0_8, %c0_9] : memref<1x9x9x128xbf16, #tpu.memory_space<vmem>>, vector<1x8x8x128xbf16>
    %14 = vector.shape_cast %13 : vector<1x8x8x128xbf16> to vector<8x8x128xbf16>
    %15 = vector.shape_cast %14 : vector<8x8x128xbf16> to vector<64x128xbf16>
    %c1 = arith.constant 1 : index
    %c0_10 = arith.constant 0 : index
    %c0_11 = arith.constant 0 : index
    %16 = vector.load %arg6[%c1, %c0_10, %c0_11] : memref<9x128x128xbf16, #tpu.memory_space<vmem>>, vector<1x128x128xbf16>
    %17 = vector.shape_cast %16 : vector<1x128x128xbf16> to vector<128x128xbf16>
    %cst_12 = arith.constant dense<0.000000e+00> : vector<64x128xf32>
    %18 = tpu.matmul %15, %17, %cst_12 {dimension_numbers = #tpu.dot_dimension_numbers<[1], [0], [0], [1], [0, 0, 1, 1], [], []>} : vector<64x128xbf16>, vector<128x128xbf16>, vector<64x128xf32> -> vector<64x128xf32>
    %19 = arith.addf %10, %18 : vector<64x128xf32>
    %c0_i32_13 = arith.constant 0 : i32
    %20 = arith.addi %1, %c0_i32_13 : i32
    %c0_14 = arith.constant 0 : index
    %21 = arith.index_cast %20 : i32 to index
    %c1_15 = arith.constant 1 : index
    %c0_16 = arith.constant 0 : index
    %22 = vector.load %arg2[%c0_14, %21, %c1_15, %c0_16] : memref<1x9x9x128xbf16, #tpu.memory_space<vmem>>, vector<1x8x8x128xbf16>
    %23 = vector.shape_cast %22 : vector<1x8x8x128xbf16> to vector<8x8x128xbf16>
    %24 = vector.shape_cast %23 : vector<8x8x128xbf16> to vector<64x128xbf16>
    %c2 = arith.constant 2 : index
    %c0_17 = arith.constant 0 : index
    %c0_18 = arith.constant 0 : index
    %25 = vector.load %arg6[%c2, %c0_17, %c0_18] : memref<9x128x128xbf16, #tpu.memory_space<vmem>>, vector<1x128x128xbf16>
    %26 = vector.shape_cast %25 : vector<1x128x128xbf16> to vector<128x128xbf16>
    %cst_19 = arith.constant dense<0.000000e+00> : vector<64x128xf32>
    %27 = tpu.matmul %24, %26, %cst_19 {dimension_numbers = #tpu.dot_dimension_numbers<[1], [0], [0], [1], [0, 0, 1, 1], [], []>} : vector<64x128xbf16>, vector<128x128xbf16>, vector<64x128xf32> -> vector<64x128xf32>
    %28 = arith.addf %19, %27 : vector<64x128xf32>
    %c0_i32_20 = arith.constant 0 : i32
    %29 = arith.addi %1, %c0_i32_20 : i32
    %c0_21 = arith.constant 0 : index
    %30 = arith.index_cast %29 : i32 to index
    %c0_22 = arith.constant 0 : index
    %c0_23 = arith.constant 0 : index
    %31 = vector.load %arg4[%c0_21, %30, %c0_22, %c0_23] : memref<1x9x9x128xbf16, #tpu.memory_space<vmem>>, vector<1x8x8x128xbf16>
    %32 = vector.shape_cast %31 : vector<1x8x8x128xbf16> to vector<8x8x128xbf16>
    %33 = vector.shape_cast %32 : vector<8x8x128xbf16> to vector<64x128xbf16>
    %c3 = arith.constant 3 : index
    %c0_24 = arith.constant 0 : index
    %c0_25 = arith.constant 0 : index
    %34 = vector.load %arg6[%c3, %c0_24, %c0_25] : memref<9x128x128xbf16, #tpu.memory_space<vmem>>, vector<1x128x128xbf16>
    %35 = vector.shape_cast %34 : vector<1x128x128xbf16> to vector<128x128xbf16>
    %cst_26 = arith.constant dense<0.000000e+00> : vector<64x128xf32>
    %36 = tpu.matmul %33, %35, %cst_26 {dimension_numbers = #tpu.dot_dimension_numbers<[1], [0], [0], [1], [0, 0, 1, 1], [], []>} : vector<64x128xbf16>, vector<128x128xbf16>, vector<64x128xf32> -> vector<64x128xf32>
    %37 = arith.addf %28, %36 : vector<64x128xf32>
    %c0_i32_27 = arith.constant 0 : i32
    %38 = arith.addi %1, %c0_i32_27 : i32
    %c0_28 = arith.constant 0 : index
    %39 = arith.index_cast %38 : i32 to index
    %c0_29 = arith.constant 0 : index
    %c0_30 = arith.constant 0 : index
    %40 = vector.load %arg5[%c0_28, %39, %c0_29, %c0_30] : memref<1x9x9x128xbf16, #tpu.memory_space<vmem>>, vector<1x8x8x128xbf16>
    %41 = vector.shape_cast %40 : vector<1x8x8x128xbf16> to vector<8x8x128xbf16>
    %42 = vector.shape_cast %41 : vector<8x8x128xbf16> to vector<64x128xbf16>
    %c4 = arith.constant 4 : index
    %c0_31 = arith.constant 0 : index
    %c0_32 = arith.constant 0 : index
    %43 = vector.load %arg6[%c4, %c0_31, %c0_32] : memref<9x128x128xbf16, #tpu.memory_space<vmem>>, vector<1x128x128xbf16>
    %44 = vector.shape_cast %43 : vector<1x128x128xbf16> to vector<128x128xbf16>
    %cst_33 = arith.constant dense<0.000000e+00> : vector<64x128xf32>
    %45 = tpu.matmul %42, %44, %cst_33 {dimension_numbers = #tpu.dot_dimension_numbers<[1], [0], [0], [1], [0, 0, 1, 1], [], []>} : vector<64x128xbf16>, vector<128x128xbf16>, vector<64x128xf32> -> vector<64x128xf32>
    %46 = arith.addf %37, %45 : vector<64x128xf32>
    %c0_i32_34 = arith.constant 0 : i32
    %47 = arith.addi %1, %c0_i32_34 : i32
    %c0_35 = arith.constant 0 : index
    %48 = arith.index_cast %47 : i32 to index
    %c1_36 = arith.constant 1 : index
    %c0_37 = arith.constant 0 : index
    %49 = vector.load %arg4[%c0_35, %48, %c1_36, %c0_37] : memref<1x9x9x128xbf16, #tpu.memory_space<vmem>>, vector<1x8x8x128xbf16>
    %50 = vector.shape_cast %49 : vector<1x8x8x128xbf16> to vector<8x8x128xbf16>
    %51 = vector.shape_cast %50 : vector<8x8x128xbf16> to vector<64x128xbf16>
    %c5 = arith.constant 5 : index
    %c0_38 = arith.constant 0 : index
    %c0_39 = arith.constant 0 : index
    %52 = vector.load %arg6[%c5, %c0_38, %c0_39] : memref<9x128x128xbf16, #tpu.memory_space<vmem>>, vector<1x128x128xbf16>
    %53 = vector.shape_cast %52 : vector<1x128x128xbf16> to vector<128x128xbf16>
    %cst_40 = arith.constant dense<0.000000e+00> : vector<64x128xf32>
    %54 = tpu.matmul %51, %53, %cst_40 {dimension_numbers = #tpu.dot_dimension_numbers<[1], [0], [0], [1], [0, 0, 1, 1], [], []>} : vector<64x128xbf16>, vector<128x128xbf16>, vector<64x128xf32> -> vector<64x128xf32>
    %55 = arith.addf %46, %54 : vector<64x128xf32>
    %c1_i32 = arith.constant 1 : i32
    %56 = arith.addi %1, %c1_i32 : i32
    %c0_41 = arith.constant 0 : index
    %57 = arith.index_cast %56 : i32 to index
    %c0_42 = arith.constant 0 : index
    %c0_43 = arith.constant 0 : index
    %58 = vector.load %arg2[%c0_41, %57, %c0_42, %c0_43] : memref<1x9x9x128xbf16, #tpu.memory_space<vmem>>, vector<1x8x8x128xbf16>
    %59 = vector.shape_cast %58 : vector<1x8x8x128xbf16> to vector<8x8x128xbf16>
    %60 = vector.shape_cast %59 : vector<8x8x128xbf16> to vector<64x128xbf16>
    %c6 = arith.constant 6 : index
    %c0_44 = arith.constant 0 : index
    %c0_45 = arith.constant 0 : index
    %61 = vector.load %arg6[%c6, %c0_44, %c0_45] : memref<9x128x128xbf16, #tpu.memory_space<vmem>>, vector<1x128x128xbf16>
    %62 = vector.shape_cast %61 : vector<1x128x128xbf16> to vector<128x128xbf16>
    %cst_46 = arith.constant dense<0.000000e+00> : vector<64x128xf32>
    %63 = tpu.matmul %60, %62, %cst_46 {dimension_numbers = #tpu.dot_dimension_numbers<[1], [0], [0], [1], [0, 0, 1, 1], [], []>} : vector<64x128xbf16>, vector<128x128xbf16>, vector<64x128xf32> -> vector<64x128xf32>
    %64 = arith.addf %55, %63 : vector<64x128xf32>
    %c1_i32_47 = arith.constant 1 : i32
    %65 = arith.addi %1, %c1_i32_47 : i32
    %c0_48 = arith.constant 0 : index
    %66 = arith.index_cast %65 : i32 to index
    %c0_49 = arith.constant 0 : index
    %c0_50 = arith.constant 0 : index
    %67 = vector.load %arg3[%c0_48, %66, %c0_49, %c0_50] : memref<1x9x9x128xbf16, #tpu.memory_space<vmem>>, vector<1x8x8x128xbf16>
    %68 = vector.shape_cast %67 : vector<1x8x8x128xbf16> to vector<8x8x128xbf16>
    %69 = vector.shape_cast %68 : vector<8x8x128xbf16> to vector<64x128xbf16>
    %c7 = arith.constant 7 : index
    %c0_51 = arith.constant 0 : index
    %c0_52 = arith.constant 0 : index
    %70 = vector.load %arg6[%c7, %c0_51, %c0_52] : memref<9x128x128xbf16, #tpu.memory_space<vmem>>, vector<1x128x128xbf16>
    %71 = vector.shape_cast %70 : vector<1x128x128xbf16> to vector<128x128xbf16>
    %cst_53 = arith.constant dense<0.000000e+00> : vector<64x128xf32>
    %72 = tpu.matmul %69, %71, %cst_53 {dimension_numbers = #tpu.dot_dimension_numbers<[1], [0], [0], [1], [0, 0, 1, 1], [], []>} : vector<64x128xbf16>, vector<128x128xbf16>, vector<64x128xf32> -> vector<64x128xf32>
    %73 = arith.addf %64, %72 : vector<64x128xf32>
    %c1_i32_54 = arith.constant 1 : i32
    %74 = arith.addi %1, %c1_i32_54 : i32
    %c0_55 = arith.constant 0 : index
    %75 = arith.index_cast %74 : i32 to index
    %c1_56 = arith.constant 1 : index
    %c0_57 = arith.constant 0 : index
    %76 = vector.load %arg2[%c0_55, %75, %c1_56, %c0_57] : memref<1x9x9x128xbf16, #tpu.memory_space<vmem>>, vector<1x8x8x128xbf16>
    %77 = vector.shape_cast %76 : vector<1x8x8x128xbf16> to vector<8x8x128xbf16>
    %78 = vector.shape_cast %77 : vector<8x8x128xbf16> to vector<64x128xbf16>
    %c8 = arith.constant 8 : index
    %c0_58 = arith.constant 0 : index
    %c0_59 = arith.constant 0 : index
    %79 = vector.load %arg6[%c8, %c0_58, %c0_59] : memref<9x128x128xbf16, #tpu.memory_space<vmem>>, vector<1x128x128xbf16>
    %80 = vector.shape_cast %79 : vector<1x128x128xbf16> to vector<128x128xbf16>
    %cst_60 = arith.constant dense<0.000000e+00> : vector<64x128xf32>
    %81 = tpu.matmul %78, %80, %cst_60 {dimension_numbers = #tpu.dot_dimension_numbers<[1], [0], [0], [1], [0, 0, 1, 1], [], []>} : vector<64x128xbf16>, vector<128x128xbf16>, vector<64x128xf32> -> vector<64x128xf32>
    %82 = arith.addf %73, %81 : vector<64x128xf32>
    %83 = vector.shape_cast %82 : vector<64x128xf32> to vector<1x8x8x128xf32>
    %c0_61 = arith.constant 0 : index
    %c0_62 = arith.constant 0 : index
    %c0_63 = arith.constant 0 : index
    %c0_64 = arith.constant 0 : index
    %84 = vector.load %arg7[%c0_61, %c0_62, %c0_63, %c0_64] : memref<1x8x8x128xf32, #tpu.memory_space<vmem>>, vector<1x8x8x128xf32>
    tpu.vector_store %arg7[%c0_61, %c0_62, %c0_63, %c0_64], %83 {strides = array<i32>} : memref<1x8x8x128xf32, #tpu.memory_space<vmem>>, vector<1x8x8x128xf32>,
    %cst_65 = arith.constant dense<0.000000e+00> : vector<128xf32>
    %85 = vector.multi_reduction <add>, %82, %cst_65 [0] : vector<64x128xf32> to vector<128xf32>
    %86 = vector.shape_cast %85 : vector<128xf32> to vector<1x128xf32>
    %87 = vector.shape_cast %86 : vector<1x128xf32> to vector<1x1x1x128xf32>
    %c0_66 = arith.constant 0 : index
    %c0_67 = arith.constant 0 : index
    %c0_68 = arith.constant 0 : index
    %c0_69 = arith.constant 0 : index
    %88 = vector.load %arg8[%c0_66, %c0_67, %c0_68, %c0_69] : memref<1x1x1x128xf32, #tpu.memory_space<vmem>>, vector<1x1x1x128xf32>
    tpu.vector_store %arg8[%c0_66, %c0_67, %c0_68, %c0_69], %87 {strides = array<i32>} : memref<1x1x1x128xf32, #tpu.memory_space<vmem>>, vector<1x1x1x128xf32>,
    %89 = arith.mulf %82, %82 : vector<64x128xf32>
    %cst_70 = arith.constant dense<0.000000e+00> : vector<128xf32>
    %90 = vector.multi_reduction <add>, %89, %cst_70 [0] : vector<64x128xf32> to vector<128xf32>
    %91 = vector.shape_cast %90 : vector<128xf32> to vector<1x128xf32>
    %92 = vector.shape_cast %91 : vector<1x128xf32> to vector<1x1x1x128xf32>
    %c0_71 = arith.constant 0 : index
    %c0_72 = arith.constant 0 : index
    %c0_73 = arith.constant 0 : index
    %c0_74 = arith.constant 0 : index
    %93 = vector.load %arg9[%c0_71, %c0_72, %c0_73, %c0_74] : memref<1x1x1x128xf32, #tpu.memory_space<vmem>>, vector<1x1x1x128xf32>
    tpu.vector_store %arg9[%c0_71, %c0_72, %c0_73, %c0_74], %92 {strides = array<i32>} : memref<1x1x1x128xf32, #tpu.memory_space<vmem>>, vector<1x1x1x128xf32>,
    return
  }
  func.func @transform_0(%arg0: i32, %arg1: i32) -> (i32, i32, i32, i32) {
    %c0_i32 = arith.constant 0 : i32
    %c0_i32_0 = arith.constant 0 : i32
    %c0_i32_1 = arith.constant 0 : i32
    %c0_i32_2 = arith.constant 0 : i32
    return %arg0, %c0_i32, %c0_i32_0, %c0_i32_1 : i32, i32, i32, i32
  }
  func.func @transform_1(%arg0: i32, %arg1: i32) -> (i32, i32, i32, i32) {
    %c0_i32 = arith.constant 0 : i32
    %c0_i32_0 = arith.constant 0 : i32
    %c0_i32_1 = arith.constant 0 : i32
    %c0_i32_2 = arith.constant 0 : i32
    return %arg0, %c0_i32, %c0_i32_0, %c0_i32_1 : i32, i32, i32, i32
  }
  func.func @transform_2(%arg0: i32, %arg1: i32) -> (i32, i32, i32, i32) {
    %c0_i32 = arith.constant 0 : i32
    %c0_i32_0 = arith.constant 0 : i32
    %c0_i32_1 = arith.constant 0 : i32
    %c0_i32_2 = arith.constant 0 : i32
    return %arg0, %c0_i32, %c0_i32_0, %c0_i32_1 : i32, i32, i32, i32
  }
  func.func @transform_3(%arg0: i32, %arg1: i32) -> (i32, i32, i32, i32) {
    %c0_i32 = arith.constant 0 : i32
    %c0_i32_0 = arith.constant 0 : i32
    %c0_i32_1 = arith.constant 0 : i32
    %c0_i32_2 = arith.constant 0 : i32
    return %arg0, %c0_i32, %c0_i32_0, %c0_i32_1 : i32, i32, i32, i32
  }
  func.func @transform_4(%arg0: i32, %arg1: i32) -> (i32, i32, i32) {
    %c0_i32 = arith.constant 0 : i32
    %c0_i32_0 = arith.constant 0 : i32
    %c0_i32_1 = arith.constant 0 : i32
    %c0_i32_2 = arith.constant 0 : i32
    return %c0_i32, %c0_i32_0, %c0_i32_1 : i32, i32, i32
  }
  func.func @transform_5(%arg0: i32, %arg1: i32) -> (i32, i32, i32, i32) {
    %c0_i32 = arith.constant 0 : i32
    %c0_i32_0 = arith.constant 0 : i32
    %c0_i32_1 = arith.constant 0 : i32
    return %arg0, %arg1, %c0_i32, %c0_i32_0 : i32, i32, i32, i32
  }
  func.func @transform_6(%arg0: i32, %arg1: i32) -> (i32, i32, i32, i32) {
    %c0_i32 = arith.constant 0 : i32
    %c0_i32_0 = arith.constant 0 : i32
    %c0_i32_1 = arith.constant 0 : i32
    return %arg0, %arg1, %c0_i32, %c0_i32_0 : i32, i32, i32, i32
  }
  func.func @transform_7(%arg0: i32, %arg1: i32) -> (i32, i32, i32, i32) {
    %c0_i32 = arith.constant 0 : i32
    %c0_i32_0 = arith.constant 0 : i32
    %c0_i32_1 = arith.constant 0 : i32
    return %arg0, %arg1, %c0_i32, %c0_i32_0 : i32, i32, i32, i32
  }
}

</mosaic_0001>

<bundles_post_ra>
// kernel: tpu_custom_call.1
= control target key start
LH: loop header
LB: loop body
LE: loop exit
PB: predicated region body
PF: predicated region fallthrough
CT: control target
= control target key end

     0   :  { %s3719_s0 = inlined_call_operand.vmem [shape: bf16[2,9,9,128], index: 0, kind: input, shape index: {}]   ;;  %s3720_s1 = inlined_call_operand.vmem [shape: bf16[2,9,9,128], index: 1, kind: input, shape index: {}]   ;;  %s3721_s2 = inlined_call_operand.vmem [shape: bf16[2,9,9,128], index: 2, kind: input, shape index: {}]   ;;  %s3722_s3 = inlined_call_operand.vmem [shape: bf16[2,9,9,128], index: 3, kind: input, shape index: {}]   ;;  %s3723_s4 = inlined_call_operand.vmem [shape: bf16[9,128,128], index: 4, kind: input, shape index: {}]   ;;  %s3724_s5 = inlined_call_operand.hbm [shape: f32[2,8,8,128], index: 5, kind: output, shape index: {0}]   ;;  %s3725_s6 = inlined_call_operand.hbm [shape: f32[2,1,1,128], index: 6, kind: output, shape index: {1}]   ;;  %s3726_s7 = inlined_call_operand.hbm [shape: f32[2,1,1,128], index: 7, kind: output, shape index: {2}]  }
   0x1   :  { %3729 = sst [smem:[#allocation9_spill]] %s3719_s0 }
   0x2   :  { %13 = vsyncpa [#allocation3], 0 }
   0x3   :  { %15 = vsyncpa [#allocation3 + $0x1], 0 }
   0x4   :  { %16 = vsyncpa [#allocation5], 0 }
   0x5   :  { %18 = vsyncpa [#allocation5 + $0x1], 0  ;;  %s3116_s24 = smov 0   ;;  %s3118_s25 = smov 0  }
   0x6   :  { %s3120_s26 = smov 0   ;;  %s3122_s27 = smov 0  }
   0x7   :  { %s3124_s28 = smov 0   ;;  %s3126_s29 = smov 0  }
   0x8 LB: > { %s3728_s30 = sadd.s32 4294967295, %s3072_s29   ;;  %s3727_s8 = sadd.s32 4294967294, %s3072_s29   ;;  %s3072_s29 = sphi %s3126_s29, %s24_s29   ;;  %s3068_s28 = sphi %s3124_s28, %s3741_s28   ;;  %s3064_s27 = sphi %s3122_s27, %s3740_s27   ;;  %s3060_s26 = sphi %s3120_s26, %s3739_s26   ;;  %s3056_s25 = sphi %s3118_s25, %s3738_s25   ;;  %s3052_s24 = sphi %s3116_s24, %s3737_s24  }
   0x9   : > { %s36_s9 = sadd.s32 1, %s3068_s28  ;;  %s170_s10 = sadd.s32 1, %s3060_s26 }
   0xa   : > { %p38_p0 = scmp.ge.s32.totalorder %s36_s9, 2  ;;  %p180_p1 = scmp.ne.s32.totalorder %s3060_s26, %s3056_s25 }
   0xb   : > { %p181_p2 = scmp.eq.s32.totalorder %s3728_s30, 1  ;;  %p186_p3 = scmp.ne.s32.totalorder %s3056_s25, %s3052_s24 }
   0xc   : > { %s3743_s9 = smov (%p38_p0, %s36_s9), 0  ;;  %p187_p5 = scmp.eq.s32.totalorder %s3727_s8, 1 }
   0xd   : > { %p3158_p4 = por %p181_p2, %p180_p1  ;;  %s165_s12 = ssub.s32 %s3068_s28, %s3743_s9 }
   0xe   : > { %p2198_p6 = scmp.ge.s32.totalorder %s3072_s29, 1  ;;  %p168_p7 = scmp.eq.s32.totalorder %s165_s12, 0 }
   0xf   : > { %p3167_p8 = por %p187_p5, %p186_p3  ;;  %p296_p9 = scmp.lt.s32.totalorder %s3072_s29, 3 }
  0x10   : > { %s3173_s14 = scalar_select %p168_p7, %s3060_s26, %s170_s10  }
  0x11   : > { %p297_p10 = pnand %p2198_p6, %p296_p9 }
  0x12   : > { %p351_p11 = scmp.lt.s32.totalorder (!%p297_p10), %s3064_s27, 1  ;;  %s3732_s0 = sld [smem:[#allocation9_spill]] (!%p297_p10) }
  0x13   : > { %300 = sbr.rel (%p297_p10) target bundleno = 375 (0x177), region = 40 }
  0x18   : > { %v2776_v0 = vld [vmem:[%s3723_s4 + $0x78] sm:$0xff]  ;;  %v2775_v2 = vld [vmem:[%s3723_s4 + $0x70] sm:$0xff]  ;;  %s352_s21 = scalar_select %p351_p11, %s3064_s27, 1  ;;  %v2774_v6 = vld [vmem:[%s3723_s4 + $0x68] sm:$0xff]  ;;  %vm645_vm0 = vsmask.f32 3328 }
  0x19   : > { %v2784_v1 = vld [vmem:[%s3723_s4 + $0xb8] sm:$0xff]  ;;  %2850 = vmatpush.bf16.msra.mxu1 %v2776_v0  ;;  %499 = vmatpush.bf16.msra.mxu0 %v2776_v0  ;;  %v2783_v3 = vld [vmem:[%s3723_s4 + $0xb0] sm:$0xff]  ;;  %v2782_v7 = vld [vmem:[%s3723_s4 + $0xa8] sm:$0xff]  ;;  %vm646_vm1 = vsmask.f32 7440 }
  0x1a   : > { %841 = vmatpush.bf16.msra.mxu2 %v2784_v1  ;;  %v2796_v4 = vld [vmem:[%s3723_s4 + $0xf8] sm:$0xff]  ;;  %s3192_s15 = smul.u32 72, %s352_s21  ;;  %v2795_v5 = vld [vmem:[%s3723_s4 + $0xf0] sm:$0xff]  ;;  %v2794_v8 = vld [vmem:[%s3723_s4 + $0xe8] sm:$0xff] }
  0x1b   : > { %977 = vmatpush.bf16.msra.mxu3 %v2796_v4  ;;  %v2773_v10 = vld [vmem:[%s3723_s4 + $0x60] sm:$0xff]  ;;  %v2772_v23 = vld [vmem:[%s3723_s4 + $0x58] sm:$0xff]  ;;  %v2771_v31 = vld [vmem:[%s3723_s4 + $0x50] sm:$0xff] }
  0x1c   : > { %s3204_s23 = scalar_lea.vmem %s3732_s0, %s3192_s15  ;;  %v2781_v12 = vld [vmem:[%s3723_s4 + $0xa0] sm:$0xff]  ;;  %v2780_v25 = vld [vmem:[%s3723_s4 + $0x98] sm:$0xff]  ;;  %v2779_v34 = vld [vmem:[%s3723_s4 + $0x90] sm:$0xff]  ;;  %s3250_s17 = scalar_lea.vmem %s3720_s1, %s3192_s15 }
  0x1d   : > { %2851 = vmatpush.bf16.msra.mxu1 %v2775_v2  ;;  %500 = vmatpush.bf16.msra.mxu0 %v2775_v2  ;;  %v629_v9 = vld [vmem:[%s3204_s23] sm:$0xf]  ;;  %v631_v11 = vld [vmem:[%s3204_s23 + $0x8] sm:$0xf]  ;;  %v630_v16 = vld [vmem:[%s3204_s23 + $0x4] sm:$0x1]  ;;  %s3281_s21 = scalar_lea.vmem %s3721_s2, %s3192_s15  ;;  %s3393_s16 = scalar_lea.vmem %s3722_s3, %s3192_s15 }
  0x1e   : > { %842 = vmatpush.bf16.msra.mxu2 %v2783_v3  ;;  %v649_v13 = vshrl.u32 %v629_v9, 16  ;;  %v652_v14 = vshll.u32 %v629_v9, 16  ;;  %v663_v15 = vshrl.u32 %v631_v11, 16  ;;  %v632_v17 = vld [vmem:[%s3204_s23 + $0xc] sm:$0x1]  ;;  %v666_v18 = vshll.u32 %v631_v11, 16  ;;  %vm3242_vm2 = vmor %vm645_vm0, %vm646_vm1 }
  0x1f   : > { %978 = vmatpush.bf16.msra.mxu3 %v2795_v5  ;;  %v2793_v19 = vld [vmem:[%s3723_s4 + $0xe0] sm:$0xff]  ;;  %v658_v27 = vshll.u32 %v630_v16, 16  ;;  %v672_v28 = vshll.u32 %v632_v17, 16  ;;  %v2792_v30 = vld [vmem:[%s3723_s4 + $0xd8] sm:$0xff]  ;;  %v633_v32 = vld [vmem:[%s3204_s23 + $0x10] sm:$0xf] }
  0x20   : > { %v651_v20 = vrot.slane %v649_v13, 4  ;;  %v654_v21 = vrot.slane %v652_v14, 5  ;;  %v665_v22 = vrot.slane %v663_v15, 4  ;;  %v668_v24 = vrot.slane %v666_v18, 5  ;;  %v635_v33 = vld [vmem:[%s3204_s23 + $0x18] sm:$0xf] }
  0x21   : > { %2852 = vmatpush.bf16.msra.mxu1 %v2774_v6  ;;  %501 = vmatpush.bf16.msra.mxu0 %v2774_v6  ;;  %v660_v36 = vrot.slane %v658_v27, 5  ;;  %v674_v38 = vrot.slane %v672_v28, 5  ;;  %v2791_v40 = vld [vmem:[%s3723_s4 + $0xd0] sm:$0xff]  ;;  %v677_v41 = vshrl.u32 %v633_v32, 16  ;;  %v680_v42 = vshll.u32 %v633_v32, 16  ;;  %v2770_v45 = vld [vmem:[%s3723_s4 + $0x48] sm:$0xff] }
  0x22   : > { %843 = vmatpush.bf16.msra.mxu2 %v2782_v7  ;;  %v655_v26 = vor.u32 %v654_v21, %v651_v20  ;;  %v669_v29 = vor.u32 %v668_v24, %v665_v22  ;;  %v691_v43 = vshrl.u32 %v635_v33, 16  ;;  %v694_v44 = vshll.u32 %v635_v33, 16  ;;  %v2778_v46 = vld [vmem:[%s3723_s4 + $0x88] sm:$0xff]  ;;  %v2769_v49 = vld [vmem:[%s3723_s4 + $0x40] sm:$0xff]  ;;  %v634_v53 = vld [vmem:[%s3204_s23 + $0x14] sm:$0x1] }
  0x23   : > { %979 = vmatpush.bf16.msra.mxu3 %v2794_v8  ;;  %v2230_v50 = vld [vmem:[%s3250_s17 + $0x20] sm:$0xf]  ;;  %v2767_v51 = vld [vmem:[%s3250_s17 + $0x24] sm:$0xf0]  ;;  %v679_v54 = vrot.slane %v677_v41, 4  ;;  %v682_v55 = vrot.slane %v680_v42, 5 }
  0x24   : > { %v656_v35 = vrot.slane %v655_v26, 4  ;;  %v670_v37 = vrot.slane %v669_v29, 4  ;;  %v2790_v52 = vld [vmem:[%s3723_s4 + $0xc8] sm:$0xff]  ;;  %v693_v56 = vrot.slane %v691_v43, 4  ;;  %v696_v57 = vrot.slane %v694_v44, 5  ;;  %v2764_v63 = vld [vmem:[%s3723_s4 + $0x38] sm:$0xff] }
  0x25   : > { %2853 = vmatpush.bf16.msra.mxu1 %v2773_v10  ;;  %502 = vmatpush.bf16.msra.mxu0 %v2773_v10  ;;  %v2222_v58 = vld [vmem:[%s3250_s17] sm:$0xf]  ;;  %v2765_v59 = vld [vmem:[%s3250_s17 + $0x4] sm:$0xf0]  ;;  %v636_v62 = vld [vmem:[%s3204_s23 + $0x1c] sm:$0x1]  ;;  %v2231_v1 = vor.u32 %v2767_v51, %v2230_v50  ;;  %v683_v6 = vor.u32 %v682_v55, %v679_v54 }
  0x26   : > { %844 = vmatpush.bf16.msra.mxu2 %v2781_v12  ;;  %v661_v47 = vsel %vm3242_vm2, %v656_v35, %v660_v36  ;;  %v675_v48 = vsel %vm3242_vm2, %v670_v37, %v674_v38  ;;  %v2777_v0 = vld [vmem:[%s3723_s4 + $0x80] sm:$0xff]  ;;  %v2808_v2 = vld [vmem:[%s3723_s4 + $0x138] sm:$0xff]  ;;  %v686_v4 = vshll.u32 %v634_v53, 16  ;;  %v2223_v5 = vor.u32 %v2765_v59, %v2222_v58  ;;  %v2785_v12 = vld [vmem:[%s3281_s21 + $0x4] sm:$0xf0] }
  0x27   : > { %980 = vmatpush.bf16.msra.mxu3 %v2793_v19  ;;  %v777_v60 = vunpack.c.l.b16 %v661_v47  ;;  %v778_v61 = vunpack.c.l.b16 %v675_v48  ;;  %v2828_v3 = vld [vmem:[%s3723_s4 + $0x1b8] sm:$0xff]  ;;  %v697_v7 = vor.u32 %v696_v57, %v693_v56  ;;  %v700_v8 = vshll.u32 %v636_v62, 16  ;;  %v2789_v10 = vld [vmem:[%s3723_s4 + $0xc0] sm:$0xff]  ;;  %v2763_v13 = vld [vmem:[%s3723_s4 + $0x30] sm:$0xff] }
  0x28   : > { %v2382_v11 = vld [vmem:[%s3281_s21] sm:$0xf]  ;;  %v2840_v14 = vld [vmem:[%s3723_s4 + $0x1f8] sm:$0xff]  ;;  %v2807_v15 = vld [vmem:[%s3723_s4 + $0x130] sm:$0xff]  ;;  %v688_v16 = vrot.slane %v686_v4, 5  ;;  %v684_v19 = vrot.slane %v683_v6, 4 }
  0x29   : > { %2854 = vmatpush.bf16.msra.mxu1 %v2772_v23  ;;  %503 = vmatpush.bf16.msra.mxu0 %v2772_v23  ;;  %v785_v9 = vpack.c.b16 %v778_v61, %v777_v60  ;;  %v2827_v17 = vld [vmem:[%s3723_s4 + $0x1b0] sm:$0xff]  ;;  %v2383_v18 = vor.u32 %v2785_v12, %v2382_v11  ;;  %v698_v20 = vrot.slane %v697_v7, 4  ;;  %v702_v21 = vrot.slane %v700_v8, 5  ;;  %v2762_v22 = vld [vmem:[%s3723_s4 + $0x28] sm:$0xff]  ;;  %v637_v24 = vld [vmem:[%s3204_s23 + $0x20] sm:$0xf] }
  0x2a   : > { %845 = vmatpush.bf16.msra.mxu2 %v2780_v25  ;;  %v2839_v23 = vld [vmem:[%s3723_s4 + $0x1f0] sm:$0xff]  ;;  %v639_v25 = vld [vmem:[%s3204_s23 + $0x28] sm:$0xf]  ;;  %v689_v28 = vsel %vm3242_vm2, %v684_v19, %v688_v16  ;;  %v2805_v36 = vld [vmem:[%s3723_s4 + $0x120] sm:$0xff] }
  0x2b   : > { %981 = vmatpush.bf16.msra.mxu3 %v2792_v30  ;;  %v2806_v26 = vld [vmem:[%s3723_s4 + $0x128] sm:$0xff]  ;;  %v703_v29 = vsel %vm3242_vm2, %v698_v20, %v702_v21  ;;  %v705_v30 = vshrl.u32 %v637_v24, 16  ;;  %v719_v32 = vshrl.u32 %v639_v25, 16  ;;  %v722_v33 = vshll.u32 %v639_v25, 16  ;;  %v2825_v37 = vld [vmem:[%s3723_s4 + $0x1a0] sm:$0xff]  ;;  %v2759_v62 = vld [vmem:[%s3723_s4 + $0x10] sm:$0xff] }
  0x2c   : > { %v2826_v27 = vld [vmem:[%s3723_s4 + $0x1a8] sm:$0xff]  ;;  %v2234_v38 = vld [vmem:[%s3250_s17 + $0x30] sm:$0xf]  ;;  %v779_v42 = vunpack.c.l.b16 %v689_v28  ;;  %v780_v43 = vunpack.c.l.b16 %v703_v29  ;;  %v2766_v44 = vld [vmem:[%s3250_s17 + $0x14] sm:$0xf0] }
  0x2d   : > { %2855 = vmatpush.bf16.msra.mxu1 %v2771_v31  ;;  %504 = vmatpush.bf16.msra.mxu0 %v2771_v31  ;;  %v708_v31 = vshll.u32 %v637_v24, 16  ;;  %v2838_v35 = vld [vmem:[%s3723_s4 + $0x1e8] sm:$0xff]  ;;  %v2226_v41 = vld [vmem:[%s3250_s17 + $0x10] sm:$0xf]  ;;  %v721_v47 = vrot.slane %v719_v32, 4  ;;  %v724_v48 = vrot.slane %v722_v33, 5 }
  0x2e   : > { %846 = vmatpush.bf16.msra.mxu2 %v2779_v34  ;;  %v2761_v34 = vld [vmem:[%s3723_s4 + $0x20] sm:$0xff]  ;;  %v640_v51 = vld [vmem:[%s3204_s23 + $0x2c] sm:$0x1]  ;;  %v2227_v54 = vor.u32 %v2766_v44, %v2226_v41  ;;  %v786_v55 = vpack.c.b16 %v780_v43, %v779_v42  ;;  %v2386_v56 = vld [vmem:[%s3281_s21 + $0x10] sm:$0xf] }
  0x2f   : > { %982 = vmatpush.bf16.msra.mxu3 %v2791_v40  ;;  %v2768_v40 = vld [vmem:[%s3250_s17 + $0x34] sm:$0xf0]  ;;  %v638_v50 = vld [vmem:[%s3204_s23 + $0x24] sm:$0x1]  ;;  %v725_v60 = vor.u32 %v724_v48, %v721_v47  ;;  %v728_v61 = vshll.u32 %v640_v51, 16  ;;  %v2758_v6 = vld [vmem:[%s3723_s4 + $0x8] sm:$0xff] }
  0x30   : > { %v2235_v53 = vor.u32 %v2768_v40, %v2234_v38  ;;  %v2786_v57 = vld [vmem:[%s3281_s21 + $0x14] sm:$0xf0]  ;;  %v714_v59 = vshll.u32 %v638_v50, 16  ;;  %v2802_v7 = vld [vmem:[%s3723_s4 + $0x108] sm:$0xff]  ;;  %v2837_v8 = vld [vmem:[%s3723_s4 + $0x1e0] sm:$0xff] }
  0x31   : > { %2856 = vmatpush.bf16.msra.mxu1 %v2770_v45  ;;  %505 = vmatpush.bf16.msra.mxu0 %v2770_v45  ;;  %v707_v45 = vrot.slane %v705_v30, 4  ;;  %v726_v4 = vrot.slane %v725_v60, 4  ;;  %v2823_v11 = vld [vmem:[%s3723_s4 + $0x190] sm:$0xff]  ;;  %v2816_v20 = vld [vmem:[%s3723_s4 + $0x178] sm:$0xff]  ;;  %v2801_v21 = vld [vmem:[%s3723_s4 + $0x100] sm:$0xff] }
  0x32   : > { %847 = vmatpush.bf16.msra.mxu2 %v2778_v46  ;;  %v710_v46 = vrot.slane %v708_v31, 5  ;;  %v2753_v24 = vld [vmem:[%s3204_s23 + $0x4] sm:$0xf0]  ;;  %v2446_v25 = vld [vmem:[%s3393_s16] sm:$0xf]  ;;  %v2815_v33 = vld [vmem:[%s3723_s4 + $0x170] sm:$0xff] }
  0x33   : > { %983 = vmatpush.bf16.msra.mxu3 %v2790_v52  ;;  %v2804_v52 = vld [vmem:[%s3723_s4 + $0x118] sm:$0xff]  ;;  %v2390_v40 = vld [vmem:[%s3281_s21 + $0x20] sm:$0xf]  ;;  %v2787_v41 = vld [vmem:[%s3281_s21 + $0x24] sm:$0xf0] }
  0x34   : > { %v711_v58 = vor.u32 %v710_v46, %v707_v45  ;;  %v2847_v42 = vld [vmem:[%s3723_s4 + $0x230] sm:$0xff]  ;;  %v2814_v47 = vld [vmem:[%s3723_s4 + $0x168] sm:$0xff] }
  0x35   : > { %2857 = vmatpush.bf16.msra.mxu1 %v2769_v49  ;;  %506 = vmatpush.bf16.msra.mxu0 %v2769_v49  ;;  %v2760_v49 = vld [vmem:[%s3723_s4 + $0x18] sm:$0xff]  ;;  %v2822_v48 = vld [vmem:[%s3723_s4 + $0x188] sm:$0xff] }
  0x36   : > { %848 = vmatpush.bf16.msra.mxu2 %v2777_v0  ;;  %v2387_v0 = vor.u32 %v2786_v57, %v2386_v56  ;;  %v2846_v50 = vld [vmem:[%s3723_s4 + $0x228] sm:$0xff]  ;;  %v2835_v56 = vld [vmem:[%s3723_s4 + $0x1d0] sm:$0xff]  ;;  %v2813_v57 = vld [vmem:[%s3723_s4 + $0x160] sm:$0xff] }
  0x37   : > { %984 = vmatpush.bf16.msra.mxu3 %v2789_v10  ;;  %v643_v10 = vld [vmem:[%s3204_s23 + $0x38] sm:$0xf] }
  0x38   : > { %517 = vmatmul.bf16.vlgmr.msra.gmra.mxu1 %v2231_v1  ;;  %507 = vmatmul.bf16.vlgmr.msra.gmra.mxu0 %v2223_v5  ;;  %v2824_v1 = vld [vmem:[%s3723_s4 + $0x198] sm:$0xff]  ;;  %v730_v5 = vrot.slane %v728_v61, 5  ;;  %v750_v19 = vshll.u32 %v643_v10, 16 }
  0x39   : > { %600 = vmatpush.bf16.msrb.mxu1 %v2764_v63  ;;  %1113 = vmatpush.bf16.msrb.mxu0 %v2808_v2  ;;  %v2803_v63 = vld [vmem:[%s3723_s4 + $0x110] sm:$0xff]  ;;  %v712_v2 = vrot.slane %v711_v58, 4  ;;  %v2845_v58 = vld [vmem:[%s3723_s4 + $0x220] sm:$0xff] }
  0x3a   : > { %1497 = vmatpush.bf16.msrb.mxu2 %v2828_v3  ;;  %985 = vmatmul.bf16.vlgmr.msra.gmra.mxu3 %v2383_v18  ;;  %v716_v3 = vrot.slane %v714_v59, 5  ;;  %v747_v18 = vshrl.u32 %v643_v10, 16  ;;  %v752_v32 = vrot.slane %v750_v19, 5  ;;  %v2834_v59 = vld [vmem:[%s3723_s4 + $0x1c8] sm:$0xff]  ;;  %v2788_v10 = vld [vmem:[%s3281_s21 + $0x34] sm:$0xf0] }
  0x3b   : > { %849 = vmatmul.bf16.vlgmr.msra.gmra.mxu2 %v785_v9  ;;  %1633 = vmatpush.bf16.msrb.mxu3 %v2840_v14  ;;  %v641_v9 = vld [vmem:[%s3204_s23 + $0x30] sm:$0xf]  ;;  %v2836_v14 = vld [vmem:[%s3723_s4 + $0x1d8] sm:$0xff]  ;;  %v2755_v19 = vld [vmem:[%s3204_s23 + $0x24] sm:$0xf0] }
  0x3c   : > { %v717_v12 = vsel %vm3242_vm2, %v712_v2, %v716_v3  ;;  %v733_v16 = vshrl.u32 %v641_v9, 16  ;;  %v749_v31 = vrot.slane %v747_v18, 4  ;;  %v2798_v2 = vld [vmem:[%s3393_s16 + $0x14] sm:$0xf0]  ;;  %v2278_v18 = vld [vmem:[%s3204_s23 + $0x20] sm:$0xf] }
  0x3d   : > { %601 = vmatpush.bf16.msrb.mxu1 %v2763_v13  ;;  %1114 = vmatpush.bf16.msrb.mxu0 %v2807_v15  ;;  %v731_v13 = vsel %vm3242_vm2, %v726_v4, %v730_v5  ;;  %v2757_v15 = vld [vmem:[%s3723_s4] sm:$0xff]  ;;  %v2811_v5 = vld [vmem:[%s3723_s4 + $0x150] sm:$0xff] }
  0x3e   : > { %1498 = vmatpush.bf16.msrb.mxu2 %v2827_v17  ;;  %v736_v17 = vshll.u32 %v641_v9, 16  ;;  %v782_v28 = vunpack.c.l.b16 %v731_v13  ;;  %v735_v29 = vrot.slane %v733_v16, 4  ;;  %v753_v45 = vor.u32 %v752_v32, %v749_v31  ;;  %v2394_v9 = vld [vmem:[%s3281_s21 + $0x30] sm:$0xf]  ;;  %v2844_v13 = vld [vmem:[%s3723_s4 + $0x218] sm:$0xff] }
  0x3f   : > { %1634 = vmatpush.bf16.msrb.mxu3 %v2839_v23  ;;  %v2848_v23 = vld [vmem:[%s3723_s4 + $0x238] sm:$0xff]  ;;  %v2843_v16 = vld [vmem:[%s3723_s4 + $0x210] sm:$0xff]  ;;  %v1150_v31 = vld [vmem:[%s3281_s21] sm:$0xf] }
  0x40   : > { %v738_v30 = vrot.slane %v736_v17, 5  ;;  %v2842_v17 = vld [vmem:[%s3723_s4 + $0x208] sm:$0xff] }
  0x41   : > { %602 = vmatpush.bf16.msrb.mxu1 %v2762_v22  ;;  %1115 = vmatpush.bf16.msrb.mxu0 %v2806_v26  ;;  %v2270_v22 = vld [vmem:[%s3204_s23] sm:$0xf]  ;;  %v2797_v26 = vld [vmem:[%s3393_s16 + $0x4] sm:$0xf0] }
  0x42   : > { %1499 = vmatpush.bf16.msrb.mxu2 %v2826_v27  ;;  %v781_v27 = vunpack.c.l.b16 %v717_v12  ;;  %v739_v43 = vor.u32 %v738_v30, %v735_v29  ;;  %v2810_v12 = vld [vmem:[%s3723_s4 + $0x148] sm:$0xff]  ;;  %v2841_v30 = vld [vmem:[%s3723_s4 + $0x200] sm:$0xff] }
  0x43   : > { %1635 = vmatpush.bf16.msrb.mxu3 %v2838_v35  ;;  %v644_v35 = vld [vmem:[%s3204_s23 + $0x3c] sm:$0x1]  ;;  %v1152_v32 = vld [vmem:[%s3281_s21 + $0x8] sm:$0xf] }
  0x44   : > { %v787_v38 = vpack.c.b16 %v782_v28, %v781_v27  ;;  %v756_v46 = vshll.u32 %v644_v35, 16  ;;  %v740_v51 = vrot.slane %v739_v43, 4  ;;  %v2638_v27 = vld [vmem:[%s3250_s17 + $0x8] sm:$0xf]  ;;  %v2829_v28 = vld [vmem:[%s3250_s17 + $0xc] sm:$0xf0] }
  0x45   : > { %603 = vmatpush.bf16.msrb.mxu1 %v2761_v34  ;;  %1116 = vmatpush.bf16.msrb.mxu0 %v2805_v36  ;;  %v642_v34 = vld [vmem:[%s3204_s23 + $0x34] sm:$0x1]  ;;  %v2271_v36 = vor.u32 %v2753_v24, %v2270_v22  ;;  %v2566_v22 = vld [vmem:[%s3204_s23 + $0x8] sm:$0xf]  ;;  %v2279_v24 = vor.u32 %v2755_v19, %v2278_v18  ;;  %v2639_v29 = vor.u32 %v2829_v28, %v2638_v27  ;;  %v1167_v35 = vshrl.u32 %v1150_v31, 16 }
  0x46   : > { %1500 = vmatpush.bf16.msrb.mxu2 %v2825_v37  ;;  %v2447_v37 = vor.u32 %v2797_v26, %v2446_v25  ;;  %v742_v44 = vshll.u32 %v642_v34, 16  ;;  %v2686_v34 = vld [vmem:[%s3204_s23 + $0x10] sm:$0xf]  ;;  %v2688_v18 = vld [vmem:[%s3204_s23 + $0x18] sm:$0xf] }
  0x47   : > { %1636 = vmatpush.bf16.msrb.mxu3 %v2837_v8  ;;  %v1704_v43 = vshll.u32 %v2686_v34, 16  ;;  %v2690_v19 = vld [vmem:[%s3204_s23 + $0x20] sm:$0xf]  ;;  %v1715_v28 = vshrl.u32 %v2688_v18, 16 }
  0x48   : > { %522 = vmatmul.bf16.gmra.mxu1 %v2235_v53  ;;  %512 = vmatmul.bf16.gmra.mxu0 %v2227_v54  ;;  %v754_v53 = vrot.slane %v753_v45, 4  ;;  %v758_v54 = vrot.slane %v756_v46, 5  ;;  %v2756_v45 = vld [vmem:[%s3204_s23 + $0x34] sm:$0xf0]  ;;  %v2458_v46 = vld [vmem:[%s3393_s16 + $0x30] sm:$0xf] }
  0x49   : > { %604 = vmatpush.bf16.msrb.mxu1 %v2760_v49  ;;  %1117 = vmatpush.bf16.msrb.mxu0 %v2804_v52  ;;  %v2391_v49 = vor.u32 %v2787_v41, %v2390_v40  ;;  %v744_v52 = vrot.slane %v742_v44, 5  ;;  %v2282_v44 = vld [vmem:[%s3204_s23 + $0x30] sm:$0xf] }
  0x4a   : > { %1501 = vmatpush.bf16.msrb.mxu2 %v2824_v1  ;;  %990 = vmatmul.bf16.gmra.mxu3 %v2387_v0  ;;  %v759_v61 = vsel %vm3242_vm2, %v754_v53, %v758_v54  ;;  %v2754_v0 = vld [vmem:[%s3204_s23 + $0x14] sm:$0xf0]  ;;  %v2450_v1 = vld [vmem:[%s3393_s16 + $0x10] sm:$0xf] }
  0x4b   : > { %854 = vmatmul.bf16.gmra.mxu2 %v786_v55  ;;  %1637 = vmatpush.bf16.msrb.mxu3 %v2836_v14  ;;  %v2821_v55 = vld [vmem:[%s3723_s4 + $0x180] sm:$0xff]  ;;  %v745_v60 = vsel %vm3242_vm2, %v740_v51, %v744_v52  ;;  %v784_v4 = vunpack.c.l.b16 %v759_v61  ;;  %v1169_v51 = vrot.slane %v1167_v35, 4  ;;  %v2687_v61 = vld [vmem:[%s3204_s23 + $0x14] sm:$0x1] }
  0x4c   : > { %v783_v3 = vunpack.c.l.b16 %v745_v60  ;;  %v2833_v14 = vld [vmem:[%s3723_s4 + $0x1c0] sm:$0xff]  ;;  %v2685_v60 = vld [vmem:[%s3204_s23 + $0xc] sm:$0x1] }
  0x4d   : > { %605 = vmatpush.bf16.msrb.mxu1 %v2759_v62  ;;  %1118 = vmatpush.bf16.msrb.mxu0 %v2803_v63  ;;  %v2812_v62 = vld [vmem:[%s3723_s4 + $0x158] sm:$0xff]  ;;  %v2274_v63 = vld [vmem:[%s3204_s23 + $0x10] sm:$0xf] }
  0x4e   : > { %1502 = vmatpush.bf16.msrb.mxu2 %v2823_v11  ;;  %v788_v8 = vpack.c.b16 %v784_v4, %v783_v3  ;;  %v2395_v11 = vor.u32 %v2788_v10, %v2394_v9  ;;  %v1710_v10 = vshll.u32 %v2687_v61, 16 }
  0x4f   : > { %1638 = vmatpush.bf16.msrb.mxu3 %v2835_v56 }
  0x51   : > { %606 = vmatpush.bf16.msrb.mxu1 %v2758_v6  ;;  %1119 = vmatpush.bf16.msrb.mxu0 %v2802_v7  ;;  %v2275_v6 = vor.u32 %v2754_v0, %v2274_v63  ;;  %v2451_v7 = vor.u32 %v2798_v2, %v2450_v1 }
  0x52   : > { %1503 = vmatpush.bf16.msrb.mxu2 %v2822_v48  ;;  %v2570_v48 = vld [vmem:[%s3204_s23 + $0x18] sm:$0xf] }
  0x53   : > { %1639 = vmatpush.bf16.msrb.mxu3 %v2834_v59  ;;  %v1706_v59 = vrot.slane %v1704_v43, 5  ;;  %v1717_v43 = vrot.slane %v1715_v28, 4 }
  0x55   : > { %607 = vmatpush.bf16.msrb.mxu1 %v2757_v15  ;;  %1120 = vmatpush.bf16.msrb.mxu0 %v2801_v21  ;;  %v2809_v15 = vld [vmem:[%s3723_s4 + $0x140] sm:$0xff]  ;;  %v2799_v21 = vld [vmem:[%s3393_s16 + $0x24] sm:$0xf0] }
  0x56   : > { %1504 = vmatpush.bf16.msrb.mxu2 %v2821_v55  ;;  %v2818_v55 = vld [vmem:[%s3204_s23 + $0x1c] sm:$0xf0] }
  0x57   : > { %1640 = vmatpush.bf16.msrb.mxu3 %v2833_v14  ;;  %v2571_v2 = vor.u32 %v2818_v55, %v2570_v48  ;;  %v1156_v14 = vld [vmem:[%s3281_s21 + $0x18] sm:$0xf] }
  0x58   : > { %608 = vmatmul.bf16.vlgmr.msrb.gmra.mxu1 %v2271_v36  ;;  %1121 = vmatmul.bf16.vlgmr.msrb.gmra.mxu0 %v2447_v37  ;;  %v1170_v36 = vshll.u32 %v1150_v31, 16  ;;  %v1181_v37 = vshrl.u32 %v1152_v32, 16  ;;  %v1212_v27 = vshll.u32 %v1156_v14, 16  ;;  %v1732_v31 = vshll.u32 %v2690_v19, 16 }
  0x59   : > { %1359 = vmatpush.bf16.msra.mxu1 %v2816_v20  ;;  %1879 = vmatpush.bf16.msra.mxu0 %v2848_v23  ;;  %v2454_v20 = vld [vmem:[%s3393_s16 + $0x20] sm:$0xf] }
  0x5a   : > { %995 = vmatmul.bf16.gmra.mxu3 %v2391_v49  ;;  %2858 = vmatpush.bf16.msra.mxu2 %v2848_v23  ;;  %v2817_v23 = vld [vmem:[%s3204_s23 + $0xc] sm:$0xf0]  ;;  %v2455_v25 = vor.u32 %v2799_v21, %v2454_v20  ;;  %v1151_v49 = vld [vmem:[%s3281_s21 + $0x4] sm:$0x1]  ;;  %v1172_v52 = vrot.slane %v1170_v36, 5  ;;  %v1183_v53 = vrot.slane %v1181_v37, 4 }
  0x5b   : > { %859 = vmatmul.bf16.gmra.mxu2 %v787_v38  ;;  %v2567_v26 = vor.u32 %v2817_v23, %v2566_v22  ;;  %v1184_v38 = vshll.u32 %v1152_v32, 16  ;;  %v1176_v63 = vshll.u32 %v1151_v49, 16  ;;  %v1712_v23 = vrot.slane %v1710_v10, 5  ;;  %v1155_v36 = vld [vmem:[%s3281_s21 + $0x14] sm:$0x1] }
  0x5c   : > { %v1173_v3 = vor.u32 %v1172_v52, %v1169_v51  ;;  %v2689_v51 = vld [vmem:[%s3204_s23 + $0x1c] sm:$0x1]  ;;  %v2691_v52 = vld [vmem:[%s3204_s23 + $0x24] sm:$0x1] }
  0x5d   : > { %1360 = vmatpush.bf16.msra.mxu1 %v2815_v33  ;;  %1880 = vmatpush.bf16.msra.mxu0 %v2847_v42  ;;  %v2684_v33 = vld [vmem:[%s3204_s23 + $0x8] sm:$0xf]  ;;  %v1186_v54 = vrot.slane %v1184_v38, 5 }
  0x5e   : > { %2859 = vmatpush.bf16.msra.mxu2 %v2847_v42  ;;  %v1687_v40 = vshrl.u32 %v2684_v33, 16  ;;  %v1690_v41 = vshll.u32 %v2684_v33, 16  ;;  %v1701_v42 = vshrl.u32 %v2686_v34, 16 }
  0x5f   : > { %v1187_v4 = vor.u32 %v1186_v54, %v1183_v53  ;;  %v2574_v53 = vld [vmem:[%s3204_s23 + $0x28] sm:$0xf]  ;;  %v2819_v54 = vld [vmem:[%s3204_s23 + $0x2c] sm:$0xf0] }
  0x60   : > { %v1689_v56 = vrot.slane %v1687_v40, 4 }
  0x61   : > { %1361 = vmatpush.bf16.msra.mxu1 %v2814_v47  ;;  %1881 = vmatpush.bf16.msra.mxu0 %v2846_v50  ;;  %v2800_v47 = vld [vmem:[%s3393_s16 + $0x34] sm:$0xf0]  ;;  %s2849_s16 = sshll.u32 %s3064_s27, 6 }
  0x62   : > { %2860 = vmatpush.bf16.msra.mxu2 %v2846_v50  ;;  %v1153_v50 = vld [vmem:[%s3281_s21 + $0xc] sm:$0x1]  ;;  %v2459_v1 = vor.u32 %v2800_v47, %v2458_v46  ;;  %v1734_v46 = vrot.slane %v1732_v31, 5  ;;  %s1982_s19 = scalar_lea.hbm %s3724_s5, %s2849_s16  ;;  %s2954_s16 = scalar_lea.hbm %s3724_s5, 128 }
  0x63   : > { %v1190_v0 = vshll.u32 %v1153_v50, 16  ;;  %s1985_s22 = sshll.u32 %s1982_s19, 4  ;;  %s1986_s22 = int_to_ptr.hbm [resolvable:$true] %s1985_s22 }
  0x64   : > { %s2948_s15 = sshra.s32 %s1986_s22, 4  ;;  %s2949_s15 = int_to_ptr.hbm [resolvable:$true] %s2948_s15 }
  0x65   : > { %1362 = vmatpush.bf16.msra.mxu1 %v2813_v57  ;;  %1882 = vmatpush.bf16.msra.mxu0 %v2845_v58  ;;  %v1692_v57 = vrot.slane %v1690_v41, 5  ;;  %v1214_v41 = vrot.slane %v1212_v27, 5  ;;  %s2950_s8 = scalar_lea.hbm %s2949_s15, 64  ;;  %p2955_p1 = scmp.lt.s32.totalorder %s2949_s15, %s3724_s5 }
  0x66   : > { %2861 = vmatpush.bf16.msra.mxu2 %v2845_v58  ;;  %v1703_v58 = vrot.slane %v1701_v42, 4  ;;  %v1157_v42 = vld [vmem:[%s3281_s21 + $0x1c] sm:$0x1]  ;;  %p2951_p12 = scmp.ne.s32.totalorder %s2949_s15, %s2950_s8  ;;  %p2956_p2 = scmp.lt.s32.totalorder %s2954_s16, %s2950_s8 }
  0x68   : > { %613 = vmatmul.bf16.gmra.mxu1 %v2275_v6  ;;  %1126 = vmatmul.bf16.gmra.mxu0 %v2451_v7  ;;  %v2830_v6 = vld [vmem:[%s3250_s17 + $0x1c] sm:$0xf0]  ;;  %v1693_v7 = vor.u32 %v1692_v57, %v1689_v56  ;;  %v1707_v9 = vor.u32 %v1706_v59, %v1703_v58  ;;  %v1204_v56 = vshll.u32 %v1155_v36, 16  ;;  %v1218_v58 = vshll.u32 %v1157_v42, 16  ;;  %v1159_v42 = vld [vmem:[%s3281_s21 + $0x24] sm:$0x1]  ;;  %p2952_p13 = pnand %p2951_p12, %p3158_p4  ;;  %p2957_p3 = por %p2956_p2, %p2955_p1 }
  0x69   : > { %1363 = vmatpush.bf16.msra.mxu1 %v2812_v62  ;;  %1883 = vmatpush.bf16.msra.mxu0 %v2844_v13  ;;  %v2283_v62 = vor.u32 %v2756_v45, %v2282_v44 }
  0x6a   : > { %1000 = vmatmul.bf16.gmra.mxu3 %v2395_v11  ;;  %2862 = vmatpush.bf16.msra.mxu2 %v2844_v13  ;;  %v1178_v11 = vrot.slane %v1176_v63, 5  ;;  %v1154_v13 = vld [vmem:[%s3281_s21 + $0x10] sm:$0xf]  ;;  %v1694_v20 = vrot.slane %v1693_v7, 4  ;;  %v1708_v22 = vrot.slane %v1707_v9, 4  ;;  %v1220_v7 = vrot.slane %v1218_v58, 5  ;;  %p2953_p0 = pneg %p2952_p13 }
  0x6b   : > { %864 = vmatmul.bf16.gmra.mxu2 %v788_v8  ;;  %v1696_v8 = vshll.u32 %v2685_v60, 16  ;;  %v1724_v60 = vshll.u32 %v2689_v51, 16  ;;  %v2578_v51 = vld [vmem:[%s3204_s23 + $0x38] sm:$0xf]  ;;  %v2697_v58 = vld [vmem:[%s3204_s23 + $0x3c] sm:$0x1] }
  0x6c   : > { %v1713_v35 = vsel %vm3242_vm2, %v1708_v22, %v1712_v23  ;;  %p2958_p5 = pnand %p2957_p3, %p2953_p0 }
  0x6d   : > { %1364 = vmatpush.bf16.msra.mxu1 %v2811_v5  ;;  %1884 = vmatpush.bf16.msra.mxu0 %v2843_v16  ;;  %v2642_v5 = vld [vmem:[%s3250_s17 + $0x18] sm:$0xf]  ;;  %v1698_v21 = vrot.slane %v1696_v8, 5  ;;  %v1816_v50 = vunpack.c.l.b16 %v1713_v35  ;;  %v1726_v9 = vrot.slane %v1724_v60, 5 }
  0x6e   : > { %2863 = vmatpush.bf16.msra.mxu2 %v2843_v16  ;;  %v1188_v16 = vrot.slane %v1187_v4, 4 }
  0x6f   : > { %v1699_v34 = vsel %vm3242_vm2, %v1694_v20, %v1698_v21  ;;  %v2696_v21 = vld [vmem:[%s3204_s23 + $0x38] sm:$0xf] }
  0x70   : > { %v1815_v49 = vunpack.c.l.b16 %v1699_v34  ;;  %v1774_v34 = vshll.u32 %v2696_v21, 16 }
  0x71   : > { %1365 = vmatpush.bf16.msra.mxu1 %v2810_v12  ;;  %1885 = vmatpush.bf16.msra.mxu0 %v2842_v17  ;;  %v1192_v12 = vrot.slane %v1190_v0, 5 }
  0x72   : > { %2864 = vmatpush.bf16.msra.mxu2 %v2842_v17  ;;  %v2643_v17 = vor.u32 %v2830_v6, %v2642_v5  ;;  %v1823_v0 = vpack.c.b16 %v1816_v50, %v1815_v49  ;;  %v1206_v5 = vrot.slane %v1204_v56, 5  ;;  %v2820_v56 = vld [vmem:[%s3204_s23 + $0x3c] sm:$0xf0] }
  0x73   : > { %v1193_v33 = vsel %vm3242_vm2, %v1188_v16, %v1192_v12  ;;  %v1158_v12 = vld [vmem:[%s3281_s21 + $0x20] sm:$0xf]  ;;  %v2694_v16 = vld [vmem:[%s3204_s23 + $0x30] sm:$0xf] }
  0x74   : > { %v1296_v48 = vunpack.c.l.b16 %v1193_v33  ;;  %v1226_v20 = vshll.u32 %v1158_v12, 16  ;;  %v1771_v33 = vshrl.u32 %v2696_v21, 16 }
  0x75   : > { %1366 = vmatpush.bf16.msra.mxu1 %v2809_v15  ;;  %1886 = vmatpush.bf16.msra.mxu0 %v2841_v30  ;;  %v1174_v15 = vrot.slane %v1173_v3, 4  ;;  %v2831_v3 = vld [vmem:[%s3250_s17 + $0x2c] sm:$0xf0] }
  0x76   : > { %2865 = vmatpush.bf16.msra.mxu2 %v2841_v30  ;;  %v1729_v30 = vshrl.u32 %v2690_v19, 16  ;;  %v1223_v19 = vshrl.u32 %v1158_v12, 16  ;;  %v1228_v36 = vrot.slane %v1226_v20, 5 }
  0x77   : > { %v1179_v32 = vsel %vm3242_vm2, %v1174_v15, %v1178_v11  ;;  %v2692_v15 = vld [vmem:[%s3204_s23 + $0x28] sm:$0xf] }
  0x78   : > { %618 = vmatmul.bf16.gmra.mxu1 %v2279_v24  ;;  %1131 = vmatmul.bf16.gmra.mxu0 %v2455_v25  ;;  %v1195_v24 = vshrl.u32 %v1154_v13, 16  ;;  %v1198_v25 = vshll.u32 %v1154_v13, 16  ;;  %v1731_v45 = vrot.slane %v1729_v30, 4  ;;  %v1295_v47 = vunpack.c.l.b16 %v1179_v32 }
  0x79   : > { %v1743_v27 = vshrl.u32 %v2692_v15, 16  ;;  %v1746_v28 = vshll.u32 %v2692_v15, 16  ;;  %v1760_v30 = vshll.u32 %v2694_v16, 16  ;;  %v1225_v35 = vrot.slane %v1223_v19, 4 }
  0x7a   : > { %1641 = vmatmul.bf16.vlgmr.msrb.gmra.mxu3 %v2639_v29  ;;  %v1718_v29 = vshll.u32 %v2688_v18, 16  ;;  %v1197_v37 = vrot.slane %v1195_v24, 4  ;;  %v1200_v38 = vrot.slane %v1198_v25, 5  ;;  %v1735_v61 = vor.u32 %v1734_v46, %v1731_v45  ;;  %v2693_v46 = vld [vmem:[%s3204_s23 + $0x2c] sm:$0x1] }
  0x7b   : > { %1505 = vmatmul.bf16.vlgmr.msrb.gmra.mxu2 %v2567_v26  ;;  %v1209_v26 = vshrl.u32 %v1156_v14, 16  ;;  %v1303_v63 = vpack.c.b16 %v1296_v48, %v1295_v47  ;;  %v1160_v14 = vld [vmem:[%s3281_s21 + $0x28] sm:$0xf]  ;;  %v1745_v47 = vrot.slane %v1743_v27, 4  ;;  %v1748_v48 = vrot.slane %v1746_v28, 5 }
  0x7c   : > { %v1720_v44 = vrot.slane %v1718_v29, 5  ;;  %v1201_v55 = vor.u32 %v1200_v38, %v1197_v37  ;;  %v1736_v10 = vrot.slane %v1735_v61, 4  ;;  %v1237_v24 = vshrl.u32 %v1160_v14, 16  ;;  %v1164_v27 = vld [vmem:[%s3281_s21 + $0x38] sm:$0xf] }
  0x7d   : > { %v1211_v40 = vrot.slane %v1209_v26, 4  ;;  %v1240_v25 = vshll.u32 %v1160_v14, 16  ;;  %v2698_v26 = vld [vmem:[%s3204_s23 + $0x40] sm:$0xf]  ;;  %v1757_v29 = vshrl.u32 %v2694_v16, 16  ;;  %v1762_v50 = vrot.slane %v1760_v30, 5 }
  0x7e   : > { %v1721_v59 = vor.u32 %v1720_v44, %v1717_v43  ;;  %v1202_v4 = vrot.slane %v1201_v55, 4  ;;  %v1785_v37 = vshrl.u32 %v2698_v26, 16  ;;  %v1788_v38 = vshll.u32 %v2698_v26, 16  ;;  %v1161_v43 = vld [vmem:[%s3281_s21 + $0x2c] sm:$0x1] }
  0x7f   : > { %v1215_v57 = vor.u32 %v1214_v41, %v1211_v40  ;;  %v1239_v44 = vrot.slane %v1237_v24, 4  ;;  %v1242_v45 = vrot.slane %v1240_v25, 5  ;;  %v1759_v49 = vrot.slane %v1757_v29, 4  ;;  %v1162_v24 = vld [vmem:[%s3281_s21 + $0x30] sm:$0xf] }
  0x80   : > { %v1722_v8 = vrot.slane %v1721_v59, 4  ;;  %v1787_v59 = vrot.slane %v1785_v37, 4  ;;  %v1790_v60 = vrot.slane %v1788_v38, 5  ;;  %v1232_v61 = vshll.u32 %v1159_v42, 16 }
  0x81   : > { %v1216_v6 = vrot.slane %v1215_v57, 4  ;;  %v1229_v57 = vor.u32 %v1228_v36, %v1225_v35  ;;  %v1265_v35 = vshrl.u32 %v1164_v27, 16  ;;  %v1268_v36 = vshll.u32 %v1164_v27, 16 }
  0x82   : > { %v1727_v22 = vsel %vm3242_vm2, %v1722_v8, %v1726_v9  ;;  %v2832_v8 = vld [vmem:[%s3250_s17 + $0x3c] sm:$0xf0]  ;;  %v1791_v12 = vor.u32 %v1790_v60, %v1787_v59  ;;  %v1234_v14 = vrot.slane %v1232_v61, 5 }
  0x83   : > { %v1221_v18 = vsel %vm3242_vm2, %v1216_v6, %v1220_v7  ;;  %v1817_v40 = vunpack.c.l.b16 %v1727_v22  ;;  %v2579_v6 = vor.u32 %v2820_v56, %v2578_v51  ;;  %v2650_v7 = vld [vmem:[%s3250_s17 + $0x38] sm:$0xf] }
  0x84   : > { %v1298_v32 = vunpack.c.l.b16 %v1221_v18  ;;  %v2651_v18 = vor.u32 %v2832_v8, %v2650_v7  ;;  %v1792_v25 = vrot.slane %v1791_v12, 4 }
  0x88   : > { %623 = vmatmul.bf16.gmra.mxu1 %v2283_v62  ;;  %1136 = vmatmul.bf16.gmra.mxu0 %v2459_v1  ;;  %v1738_v62 = vshll.u32 %v2691_v52, 16  ;;  %v2575_v1 = vor.u32 %v2819_v54, %v2574_v53  ;;  %v2695_v52 = vld [vmem:[%s3204_s23 + $0x34] sm:$0x1]  ;;  %v1773_v53 = vrot.slane %v1771_v33, 4  ;;  %v1776_v54 = vrot.slane %v1774_v34, 5 }
  0x89   : > { %v1254_v34 = vshll.u32 %v1162_v24, 16 }
  0x8a   : > { %1646 = vmatmul.bf16.gmra.mxu3 %v2643_v17  ;;  %v1740_v11 = vrot.slane %v1738_v62, 5  ;;  %v1207_v17 = vsel %vm3242_vm2, %v1202_v4, %v1206_v5  ;;  %v1243_v62 = vor.u32 %v1242_v45, %v1239_v44  ;;  %v1763_v4 = vor.u32 %v1762_v50, %v1759_v49  ;;  %v1165_v50 = vld [vmem:[%s3281_s21 + $0x3c] sm:$0x1] }
  0x8b   : > { %1510 = vmatmul.bf16.gmra.mxu2 %v2571_v2  ;;  %v2646_v2 = vld [vmem:[%s3250_s17 + $0x28] sm:$0xf]  ;;  %v1297_v31 = vunpack.c.l.b16 %v1207_v17  ;;  %v1766_v5 = vshll.u32 %v2695_v52, 16  ;;  %v1777_v9 = vor.u32 %v1776_v54, %v1773_v53  ;;  %v1270_v49 = vrot.slane %v1268_v36, 5 }
  0x8c   : > { %v2647_v13 = vor.u32 %v2831_v3, %v2646_v2  ;;  %v1741_v23 = vsel %vm3242_vm2, %v1736_v10, %v1740_v11  ;;  %v1749_v3 = vor.u32 %v1748_v48, %v1745_v47  ;;  %v1780_v10 = vshll.u32 %v2697_v58, 16 }
  0x8d   : > { %v1818_v41 = vunpack.c.l.b16 %v1741_v23  ;;  %v1304_v55 = vpack.c.b16 %v1298_v32, %v1297_v31  ;;  %v1230_v11 = vrot.slane %v1229_v57, 4  ;;  %v1244_v15 = vrot.slane %v1243_v62, 4 }
  0x8e   : > { %v1750_v19 = vrot.slane %v1749_v3, 4  ;;  %v1764_v20 = vrot.slane %v1763_v4, 4  ;;  %v1768_v21 = vrot.slane %v1766_v5, 5  ;;  %v1778_v22 = vrot.slane %v1777_v9, 4 }
  0x8f   : > { %v1824_v2 = vpack.c.b16 %v1818_v41, %v1817_v40  ;;  %v1782_v23 = vrot.slane %v1780_v10, 5  ;;  %v1235_v28 = vsel %vm3242_vm2, %v1230_v11, %v1234_v14  ;;  %v1251_v32 = vshrl.u32 %v1162_v24, 16 }
  0x90   : > { %v1769_v31 = vsel %vm3242_vm2, %v1764_v20, %v1768_v21  ;;  %v1299_v38 = vunpack.c.l.b16 %v1235_v28  ;;  %v1256_v47 = vrot.slane %v1254_v34, 5  ;;  %v1267_v48 = vrot.slane %v1265_v35, 4 }
  0x91   : > { %v1783_v33 = vsel %vm3242_vm2, %v1778_v22, %v1782_v23  ;;  %v1820_v42 = vunpack.c.l.b16 %v1769_v31  ;;  %v1253_v44 = vrot.slane %v1251_v32, 4  ;;  %v1274_v59 = vshll.u32 %v1165_v50, 16 }
  0x92   : > { %v1271_v58 = vor.u32 %v1270_v49, %v1267_v48 }
  0x93   : > { %v1257_v57 = vor.u32 %v1256_v47, %v1253_v44 }
  0x94   : > { %v1272_v62 = vrot.slane %v1271_v58, 4 }
  0x95   : > { %v1258_v60 = vrot.slane %v1257_v57, 4 }
  0x98   : > { %1367 = vmatmul.bf16.vlgmr.msra.gmra.mxu1 %v1303_v63  ;;  %1887 = vmatmul.bf16.vlgmr.msra.gmra.mxu0 %v1823_v0  ;;  %v1246_v63 = vshll.u32 %v1161_v43, 16  ;;  %v1752_v0 = vshll.u32 %v2693_v46, 16  ;;  %v1821_v43 = vunpack.c.l.b16 %v1783_v33  ;;  %v1163_v46 = vld [vmem:[%s3281_s21 + $0x34] sm:$0x1] }
  0x99   : > { %v1260_v53 = vshll.u32 %v1163_v46, 16 }
  0x9a   : > { %1651 = vmatmul.bf16.gmra.mxu3 %v2647_v13  ;;  %v1248_v16 = vrot.slane %v1246_v63, 5  ;;  %v1754_v17 = vrot.slane %v1752_v0, 5  ;;  %v1276_v63 = vrot.slane %v1274_v59, 5 }
  0x9b   : > { %1515 = vmatmul.bf16.gmra.mxu2 %v2575_v1  ;;  %v2699_v1 = vld [vmem:[%s3204_s23 + $0x44] sm:$0x1]  ;;  %v1262_v61 = vrot.slane %v1260_v53, 5  ;;  %s3598_s23 = sand.u32 1, %s3056_s25  }
  0x9c   : > { %v1794_v13 = vshll.u32 %v2699_v1, 16  ;;  %v1249_v29 = vsel %vm3242_vm2, %v1244_v15, %v1248_v16  ;;  %v1755_v30 = vsel %vm3242_vm2, %v1750_v19, %v1754_v17  ;;  %v1277_v4 = vsel %vm3242_vm2, %v1272_v62, %v1276_v63  ;;  %s2199_s17 = sshll.u32 %s3598_s23, 6  ;;  %s1961_s10 = scalar_lea.sflag [#allocation3], %s3598_s23 }
  0x9d   : > { %v1300_v40 = vunpack.c.l.b16 %v1249_v29  ;;  %v1819_v41 = vunpack.c.l.b16 %v1755_v30  ;;  %v1263_v3 = vsel %vm3242_vm2, %v1258_v60, %v1262_v61  ;;  %v1302_v7 = vunpack.c.l.b16 %v1277_v4  ;;  %s3601_s21 = scalar_lea.vmem [#allocation2], %s2199_s17 }
  0x9e   : > { %v1796_v26 = vrot.slane %v1794_v13, 5  ;;  %s1983_s20 = sshll.u32 %s3601_s21, 4  ;;  %s1984_s20 = int_to_ptr.vmem [resolvable:$true] %s1983_s20 }
  0x9f   : > { %v1305_v51 = vpack.c.b16 %v1300_v40, %v1299_v38  ;;  %v1825_v52 = vpack.c.b16 %v1820_v42, %v1819_v41 }
  0xa0   : > { %v1797_v37 = vsel %vm3242_vm2, %v1792_v25, %v1796_v26 }
  0xa1   : > { %v1822_v45 = vunpack.c.l.b16 %v1797_v37 }
  0xa3   : > { %v1826_v56 = vpack.c.b16 %v1822_v45, %v1821_v43 }
  0xa8   : > { %1372 = vmatmul.bf16.gmra.mxu1 %v1304_v55  ;;  %1892 = vmatmul.bf16.gmra.mxu0 %v1824_v2 }
  0xaa   : > { %1656 = vmatmul.bf16.gmra.mxu3 %v2651_v18 }
  0xab   : > { %1520 = vmatmul.bf16.gmra.mxu2 %v2579_v6  ;;  %v1301_v6 = vunpack.c.l.b16 %v1263_v3 }
  0xad   : > { %v1306_v8 = vpack.c.b16 %v1302_v7, %v1301_v6 }
  0xb5   : > { %v518_v54 = vpop.f32.mrf.mxu1  ;;  %v508_v55 = vpop.f32.mrf.mxu0 }
  0xb8   : > { %1377 = vmatmul.bf16.gmra.mxu1 %v1305_v51  ;;  %1897 = vmatmul.bf16.gmra.mxu0 %v1825_v52 }
  0xbb   : > { %1902 = vmatmul.bf16.vlgmr.msra.gmra.mxu2 %v1826_v56 }
  0xbd   : > { %v520_v1 = vpop.f32.mrf.mxu1  ;;  %v510_v2 = vpop.f32.mrf.mxu0 }
  0xbe   : > { %v850_v0 = vpop.f32.mrf.mxu2  ;;  %v986_v5 = vpop.f32.mrf.mxu3 }
  0xc5   : > { %v523_v10 = vpop.f32.mrf.mxu1  ;;  %v513_v11 = vpop.f32.mrf.mxu0 }
  0xc6   : > { %v852_v9 = vpop.f32.mrf.mxu2  ;;  %v988_v12 = vpop.f32.mrf.mxu3 }
  0xc8   : > { %1382 = vmatmul.bf16.gmra.mxu1 %v1306_v8 }
  0xcd   : > { %v525_v14 = vpop.f32.mrf.mxu1  ;;  %v515_v15 = vpop.f32.mrf.mxu0 }
  0xce   : > { %v855_v13 = vpop.f32.mrf.mxu2  ;;  %v3567_v16 = vpop.f32.mrf.mxu3 }
  0xd5   : > { %v609_v18 = vpop.f32.mrf.mxu1  ;;  %v1122_v19 = vpop.f32.mrf.mxu0 }
  0xd6   : > { %v857_v17 = vpop.f32.mrf.mxu2  ;;  %v610_v20 = vadd.f32 %v609_v18, %v508_v55  ;;  %v3569_v21 = vpop.f32.mrf.mxu3 }
  0xd8   : > { %v870_v39 = vadd.f32 %v850_v0, %v610_v20 }
  0xda   : > { %v1006_v62 = vadd.f32 %v986_v5, %v870_v39 }
  0xdc   : > { %v1142_v0 = vadd.f32 %v1122_v19, %v1006_v62 }
  0xdd   : > { %v611_v23 = vpop.f32.mrf.mxu1  ;;  %v1124_v24 = vpop.f32.mrf.mxu0 }
  0xde   : > { %v860_v22 = vpop.f32.mrf.mxu2  ;;  %v612_v25 = vadd.f32 %v611_v23, %v510_v2  ;;  %v3571_v27 = vpop.f32.mrf.mxu3 }
  0xe0   : > { %v871_v26 = vadd.f32 %v852_v9, %v612_v25 }
  0xe2   : > { %v1007_v7 = vadd.f32 %v988_v12, %v871_v26 }
  0xe5   : > { %v614_v29 = vpop.f32.mrf.mxu1  ;;  %v1127_v30 = vpop.f32.mrf.mxu0 }
  0xe6   : > { %v862_v28 = vpop.f32.mrf.mxu2  ;;  %v615_v31 = vadd.f32 %v614_v29, %v513_v11  ;;  %v3573_v34 = vpop.f32.mrf.mxu3 }
  0xe8   : > { %v872_v32 = vadd.f32 %v855_v13, %v615_v31 }
  0xed   : > { %v616_v35 = vpop.f32.mrf.mxu1  ;;  %v3575_v36 = vpop.f32.mrf.mxu0 }
  0xee   : > { %v865_v33 = vpop.f32.mrf.mxu2  ;;  %v617_v37 = vadd.f32 %v616_v35, %v515_v15  ;;  %v3579_v44 = vpop.f32.mrf.mxu3 }
  0xf0   : > { %v873_v38 = vadd.f32 %v857_v17, %v617_v37  ;;  %v1008_v17 = vadd.f32 %v3567_v16, %v872_v32 }
  0xf2   : > { %v1144_v12 = vadd.f32 %v1127_v30, %v1008_v17  ;;  %v1009_v29 = vadd.f32 %v3569_v21, %v873_v38 }
  0xf4   : > { %v1145_v32 = vadd.f32 %v3575_v36, %v1009_v29 }
  0xf5   : > { %v619_v41 = vpop.f32.mrf.mxu1  ;;  %v3577_v42 = vpop.f32.mrf.mxu0 }
  0xf6   : > { %v867_v40 = vpop.f32.mrf.mxu2  ;;  %v620_v43 = vadd.f32 %v619_v41, %v518_v54  ;;  %v3587_v51 = vpop.f32.mrf.mxu3 }
  0xf8   : > { %v3581_v45 = vadd.f32 %v860_v22, %v620_v43 }
  0xfd   : > { %v621_v47 = vpop.f32.mrf.mxu1  ;;  %v3583_v48 = vpop.f32.mrf.mxu0 }
  0xfe   : > { %v1506_v46 = vpop.f32.mrf.mxu2  ;;  %v622_v49 = vadd.f32 %v621_v47, %v520_v1  ;;  %v1642_v57 = vpop.f32.mrf.mxu3 }
 0x100   : > { %v3585_v50 = vadd.f32 %v862_v28, %v622_v49  ;;  %v1010_v49 = vadd.f32 %v3571_v27, %v3581_v45 }
 0x105   : > { %v624_v53 = vpop.f32.mrf.mxu1  ;;  %v3589_v55 = vpop.f32.mrf.mxu0 }
 0x106   : > { %v1508_v52 = vpop.f32.mrf.mxu2  ;;  %v625_v56 = vadd.f32 %v624_v53, %v523_v10  ;;  %v1644_v1 = vpop.f32.mrf.mxu3  ;;  %v1143_v10 = vadd.f32 %v1124_v24, %v1007_v7 }
 0x108   : > { %v3591_v54 = vadd.f32 %v865_v33, %v625_v56  ;;  %v1146_v56 = vadd.f32 %v3577_v42, %v1010_v49 }
 0x10d   : > { %v626_v59 = vpop.f32.mrf.mxu1  ;;  %v3593_v60 = vpop.f32.mrf.mxu0 }
 0x10e   : > { %v1511_v58 = vpop.f32.mrf.mxu2  ;;  %v627_v61 = vadd.f32 %v626_v59, %v525_v14  ;;  %v1647_v15 = vpop.f32.mrf.mxu3 }
 0x110   : > { %v3595_v63 = vadd.f32 %v867_v40, %v627_v61 }
 0x115   : > { %v1368_v2 = vpop.f32.mrf.mxu1  ;;  %v1888_v3 = vpop.f32.mrf.mxu0 }
 0x116   : > { %v1388_v4 = vadd.f32 %v1368_v2, %v1142_v0  ;;  %v1513_v6 = vpop.f32.mrf.mxu2  ;;  %v1649_v35 = vpop.f32.mrf.mxu3 }
 0x118   : > { %v1526_v8 = vadd.f32 %v1506_v46, %v1388_v4 }
 0x11a   : > { %v1662_v9 = vadd.f32 %v1642_v57, %v1526_v8 }
 0x11c   : > { %v1908_v11 = vadd.f32 %v1888_v3, %v1662_v9 }
 0x11d   : > { %v1370_v13 = vpop.f32.mrf.mxu1  ;;  %v1890_v14 = vpop.f32.mrf.mxu0 }
 0x11e   : > { %1916 = vst [vmem:[%s3601_s21] sm:$0xff] %v1908_v11  ;;  %v1389_v5 = vadd.f32 %v1370_v13, %v1143_v10  ;;  %v1516_v19 = vpop.f32.mrf.mxu2  ;;  %v1938_v24 = vmul.f32 %v1908_v11, %v1908_v11  ;;  %v1652_v53 = vpop.f32.mrf.mxu3 }
 0x120   : > { %v1527_v18 = vadd.f32 %v1508_v52, %v1389_v5 }
 0x122   : > { %v1663_v20 = vadd.f32 %v1644_v1, %v1527_v18  ;;  %v1011_v1 = vadd.f32 %v3573_v34, %v3585_v50 }
 0x124   : > { %v1909_v39 = vadd.f32 %v1890_v14, %v1663_v20  ;;  %v1147_v3 = vadd.f32 %v3583_v48, %v1011_v1 }
 0x125   : > { %v1373_v22 = vpop.f32.mrf.mxu1  ;;  %v1893_v23 = vpop.f32.mrf.mxu0 }
 0x126   : > { %1917 = vst [vmem:[%s3601_s21 + $0x8] sm:$0xff] %v1909_v39  ;;  %v1924_v25 = vadd.f32 %v1909_v39, %v1908_v11  ;;  %v1939_v26 = vmul.f32 %v1909_v39, %v1909_v39  ;;  %v1390_v28 = vadd.f32 %v1373_v22, %v1144_v12  ;;  %v1518_v16 = vpop.f32.mrf.mxu2  ;;  %v1654_v42 = vpop.f32.mrf.mxu3  ;;  %v1012_v11 = vadd.f32 %v3579_v44, %v3591_v54 }
 0x127   : > { %v1013_v12 = vadd.f32 %v3587_v51, %v3595_v63 }
 0x128   : > { %v1946_v31 = vadd.f32 %v1939_v26, %v1938_v24  ;;  %v1528_v33 = vadd.f32 %v1511_v58, %v1390_v28  ;;  %v1148_v5 = vadd.f32 %v3589_v55, %v1012_v11 }
 0x12a   : > { %v1664_v37 = vadd.f32 %v1647_v15, %v1528_v33 }
 0x12c   : > { %v1910_v40 = vadd.f32 %v1893_v23, %v1664_v37  ;;  %v1149_v23 = vadd.f32 %v3593_v60, %v1013_v12 }
 0x12d   : > { %v1375_v30 = vpop.f32.mrf.mxu1  ;;  %v1895_v41 = vpop.f32.mrf.mxu0 }
 0x12e   : > { %1918 = vst [vmem:[%s3601_s21 + $0x10] sm:$0xff] %v1910_v40  ;;  %v1925_v43 = vadd.f32 %v1924_v25, %v1910_v40  ;;  %v1940_v46 = vmul.f32 %v1910_v40, %v1910_v40  ;;  %v1391_v47 = vadd.f32 %v1375_v30, %v1145_v32  ;;  %v1521_v36 = vpop.f32.mrf.mxu2  ;;  %v1657_v20 = vpop.f32.mrf.mxu3 }
 0x130   : > { %v1947_v52 = vadd.f32 %v1946_v31, %v1940_v46  ;;  %v1529_v21 = vadd.f32 %v1513_v6, %v1391_v47 }
 0x132   : > { %v1665_v38 = vadd.f32 %v1649_v35, %v1529_v21 }
 0x134   : > { %v1911_v57 = vadd.f32 %v1895_v41, %v1665_v38 }
 0x135   : > { %v1378_v58 = vpop.f32.mrf.mxu1  ;;  %v1898_v0 = vpop.f32.mrf.mxu0 }
 0x136   : > { %1919 = vst [vmem:[%s3601_s21 + $0x18] sm:$0xff] %v1911_v57  ;;  %v1926_v59 = vadd.f32 %v1925_v43, %v1911_v57  ;;  %v1941_v61 = vmul.f32 %v1911_v57, %v1911_v57  ;;  %v1392_v62 = vadd.f32 %v1378_v58, %v1146_v56  ;;  %v1523_v10 = vpop.f32.mrf.mxu2  ;;  %v1659_v29 = vpop.f32.mrf.mxu3 }
 0x138   : > { %v1948_v2 = vadd.f32 %v1947_v52, %v1941_v61  ;;  %v1530_v27 = vadd.f32 %v1516_v19, %v1392_v62 }
 0x13a   : > { %v1666_v45 = vadd.f32 %v1652_v53, %v1530_v27 }
 0x13c   : > { %v1912_v4 = vadd.f32 %v1898_v0, %v1666_v45 }
 0x13d   : > { %v1380_v6 = vpop.f32.mrf.mxu1  ;;  %v1900_v34 = vpop.f32.mrf.mxu0 }
 0x13e   : > { %1920 = vst [vmem:[%s3601_s21 + $0x20] sm:$0xff] %v1912_v4  ;;  %v1927_v7 = vadd.f32 %v1926_v59, %v1912_v4  ;;  %v1942_v8 = vmul.f32 %v1912_v4, %v1912_v4  ;;  %v1393_v9 = vadd.f32 %v1380_v6, %v1147_v3  ;;  %v1903_v39 = vpop.f32.mrf.mxu2 }
 0x140   : > { %v1949_v13 = vadd.f32 %v1948_v2, %v1942_v8  ;;  %v1531_v14 = vadd.f32 %v1518_v16, %v1393_v9 }
 0x142   : > { %v1667_v50 = vadd.f32 %v1654_v42, %v1531_v14 }
 0x144   : > { %v1913_v48 = vadd.f32 %v1900_v34, %v1667_v50 }
 0x145   : > { %v1383_v15 = vpop.f32.mrf.mxu1 }
 0x146   : > { %1921 = vst [vmem:[%s3601_s21 + $0x28] sm:$0xff] %v1913_v48  ;;  %v1928_v17 = vadd.f32 %v1927_v7, %v1913_v48  ;;  %v1943_v18 = vmul.f32 %v1913_v48, %v1913_v48  ;;  %v1394_v19 = vadd.f32 %v1383_v15, %v1148_v5  ;;  %v1905_v60 = vpop.f32.mrf.mxu2 }
 0x148   : > { %v1950_v44 = vadd.f32 %v1949_v13, %v1943_v18  ;;  %v1532_v54 = vadd.f32 %v1521_v36, %v1394_v19 }
 0x14a   : > { %v1668_v22 = vadd.f32 %v1657_v20, %v1532_v54 }
 0x14c   : > { %v1914_v55 = vadd.f32 %v1903_v39, %v1668_v22 }
 0x14d   : > { %v1385_v24 = vpop.f32.mrf.mxu1 }
 0x14e   : > { %1922 = vst [vmem:[%s3601_s21 + $0x30] sm:$0xff] %v1914_v55  ;;  %v1929_v25 = vadd.f32 %v1928_v17, %v1914_v55  ;;  %v1944_v26 = vmul.f32 %v1914_v55, %v1914_v55  ;;  %v1395_v51 = vadd.f32 %v1385_v24, %v1149_v23 }
 0x150   : > { %v1951_v63 = vadd.f32 %v1950_v44, %v1944_v26  ;;  %v1533_v28 = vadd.f32 %v1523_v10, %v1395_v51 }
 0x152   : > { %v1669_v31 = vadd.f32 %v1659_v29, %v1533_v28 }
 0x154   : > { %v1915_v33 = vadd.f32 %v1905_v60, %v1669_v31 }
 0x156   : > { %1923 = vst [vmem:[%s3601_s21 + $0x38] sm:$0xff] %v1915_v33  ;;  %v1930_v35 = vadd.f32 %v1929_v25, %v1915_v33  ;;  %v1945_v37 = vmul.f32 %v1915_v33, %v1915_v33 }
 0x157   : > { %2961 = shalt.err (!%p2958_p5)
}
 0x158   : > { %s3074_s21 = smov 128   ;;  %s3075_s19 = smov 8   ;;  %v1952_v16 = vadd.f32 %v1951_v63, %v1945_v37  ;;  %v1931_v32 = vrot.slane %v1930_v35, 4 }
 0x159   : > { %2867 = dma.vmem_to_hbm [thread:$0]  (%p3158_p4), %s1984_s20, 1024, %s1986_s22, %s1961_s10, %s3074_s21, %s3074_s21, %s3075_s19  }
 0x15a   : > { %v1932_v40 = vadd.f32 %v1931_v32, %v1930_v35  ;;  %v1953_v30 = vrot.slane %v1952_v16, 4  ;;  %s1998_s12 = scalar_lea.hbm %s3725_s6, %s3064_s27  ;;  %s3735_s17 = sadd.s32 4294967295, %s3072_s29  }
 0x15b   : > { %s3648_s16 = sand.u32 1, %s3735_s17   ;;  %s2012_s20 = scalar_lea.hbm %s3726_s7, %s3064_s27 }
 0x15c   : > { %v1933_v41 = vrot.slane %v1932_v40, 2  ;;  %v1954_v43 = vadd.f32 %v1953_v30, %v1952_v16  ;;  %s344_s22 = scalar_lea.vmem [#allocation4], %s3598_s23  ;;  %s3657_s21 = sshll.u32 %s1998_s12, 4  ;;  %s2003_s21 = int_to_ptr.hbm [resolvable:$true] %s3657_s21 }
 0x15d   : > { %s3655_s10 = sshll.u32 %s344_s22, 4  ;;  %s350_s19 = scalar_lea.vmem [#allocation6], %s3598_s23  ;;  %s2001_s10 = int_to_ptr.vmem [resolvable:$true] %s3655_s10 }
 0x15e   : > { %v1934_v46 = vadd.f32 %v1933_v41, %v1932_v40  ;;  %v1955_v47 = vrot.slane %v1954_v43, 2  ;;  %s3660_s15 = sshll.u32 %s350_s19, 4  ;;  %s3662_s8 = sshll.u32 %s2012_s20, 4  ;;  %s2015_s15 = int_to_ptr.vmem [resolvable:$true] %s3660_s15  ;;  %s2017_s8 = int_to_ptr.hbm [resolvable:$true] %s3662_s8 }
 0x15f   : > { %s1966_s27 = scalar_lea.sflag [#allocation5], %s3648_s16  ;;  %s2976_s12 = sshra.s32 %s2003_s21, 4  ;;  %s2977_s12 = int_to_ptr.hbm [resolvable:$true] %s2976_s12 }
 0x160   : > { %v1935_v49 = vrot.slane %v1934_v46, 1  ;;  %v1956_v52 = vadd.f32 %v1955_v47, %v1954_v43  ;;  %s2978_s17 = scalar_lea.hbm %s2977_s12, 1  ;;  %s2982_s18 = scalar_lea.hbm %s3725_s6, 2 }
 0x161   : > { %p2979_p6 = scmp.ne.s32.totalorder %s2977_s12, %s2978_s17  ;;  %p2983_p10 = scmp.lt.s32.totalorder %s2977_s12, %s3725_s6 }
 0x162   : > { %v1936_v21 = vadd.f32 %v1935_v49, %v1934_v46  ;;  %v1957_v38 = vrot.slane %v1956_v52, 1  ;;  %p2984_p11 = scmp.lt.s32.totalorder %s2982_s18, %s2978_s17 }
 0x163   : > { %p2980_p7 = pnand %p2979_p6, %p3158_p4 }
 0x164   : > { %1937 = vst [vmem:[%s344_s22] sm:$0x1] %v1936_v21  ;;  %v1958_v53 = vadd.f32 %v1957_v38, %v1956_v52  ;;  %p2985_p12 = por %p2984_p11, %p2983_p10 }
 0x165   : > { %p2981_p9 = pneg %p2980_p7 }
 0x167   : > { %p2986_p13 = pnand %p2985_p12, %p2981_p9 }
 0x169   : > { %2989 = shalt.err (!%p2986_p13)
}
 0x16a   : > { %2868 = dma.vmem_to_hbm [thread:$0]  (%p3158_p4), %s2001_s10, 16, %s2003_s21, %s1966_s27   ;;  %1959 = vst [vmem:[%s350_s19] sm:$0x1] %v1958_v53 }
 0x16b   : > { %s3004_s16 = sshra.s32 %s2017_s8, 4  ;;  %s3010_s17 = scalar_lea.hbm %s3726_s7, 2  ;;  %s3005_s16 = int_to_ptr.hbm [resolvable:$true] %s3004_s16 }
 0x16c   : > { %s3006_s22 = scalar_lea.hbm %s3005_s16, 1  ;;  %p3011_p3 = scmp.lt.s32.totalorder %s3005_s16, %s3726_s7 }
 0x16d   : > { %p3007_p0 = scmp.ne.s32.totalorder %s3005_s16, %s3006_s22  ;;  %p3012_p5 = scmp.lt.s32.totalorder %s3010_s17, %s3006_s22 }
 0x16f   : > { %p3008_p1 = pnand %p3007_p0, %p3158_p4  ;;  %p3013_p6 = por %p3012_p5, %p3011_p3 }
 0x171   : > { %p3009_p2 = pneg %p3008_p1 }
 0x173   : > { %p3014_p7 = pnand %p3013_p6, %p3009_p2 }
 0x175   : > { %3017 = shalt.err (!%p3014_p7)
}
 0x176   : > { %2869 = dma.vmem_to_hbm [thread:$0]  (%p3158_p4), %s2015_s15, 16, %s2017_s8, %s1966_s27  }
 0x177 PF: > { %p2883_p9 = scmp.ge.s32.totalorder %s3072_s29, 2  ;;  %s2028_s10 = sand.u32 1, %s3052_s24  }
 0x178   : > { %s2029_s21 = scalar_lea.sflag [#allocation3], %s2028_s10 }
 0x179   : > { %p2874_p10 = pnand %p2883_p9, %p3167_p8 }
 0x17b   : > { %p2875_p11 = pneg %p2874_p10 }
 0x17d   : > { %3043 = dma.done.wait (%p2875_p11), %s2029_s21, 1024  }
 0x17e   : > { %3045 = vsyncadd (%p2875_p11), %s2029_s21, 4294966272  ;;  %s3736_s19 = sadd.s32 4294967294, %s3072_s29  }
 0x17f   : > { %s2038_s11 = sand.u32 1, %s3736_s19  }
 0x180   : > { %s2039_s18 = scalar_lea.sflag [#allocation5], %s2038_s11 }
 0x181   : > { %3047 = dma.done.wait (%p2875_p11), %s2039_s18, 32  }
 0x182   : > { %3049 = vsyncadd (%p2875_p11), %s2039_s18, 4294967264  ;;  %s24_s29 = sadd.s32 1, %s3072_s29   ;;  %s3737_s24 = smov %s3056_s25 }
 0x183   : > { %p21_p4 = scmp.ge.s32.totalorder %s24_s29, 4   ;;  %s3738_s25 = smov %s3060_s26 }
 0x184   : > { %s3739_s26 = smov %s3173_s14  ;;  %s3740_s27 = smov %s3068_s28 }
 0x185   : > { %s3741_s28 = smov %s3743_s9  ;;  %23 = sbr.rel (!%p21_p4) target bundleno = 8 (0x8), region = 130 }
 0x18a   :  { %2053 = vsyncpa [#allocation3], 1 }
 0x18b   :  { %2055 = vsyncpa [#allocation3 + $0x1], 1 }
 0x18c   :  { %2056 = vsyncpa [#allocation5], 1 }
 0x18d   :  { %2058 = vsyncpa [#allocation5 + $0x1], 1 }

</bundles_post_ra>
